<compile_context>
chip_gen: v5e
topology: v5e:2x2
jax: 0.10.0
libtpu: 0.0.40
codegen_flags: <defaults>
</compile_context>

<pallas_src>
import jax
import jax.numpy as jnp
from jax.experimental import pallas as pl
from jax.experimental.pallas import tpu as pltpu

# ----------------------- synthetic LLM config (toy sizes) -----------------------
B, T, D = 2, 8, 32          # batch, seq len, hidden
H = 4                       # attention heads
HD = D // H                 # head dim
G = 3 * H                   # q/k/v head groups stacked on one batched (leading) axis
MLP = 2 * D                 # MLP hidden
V = 64                      # vocab
VP = 128                    # vocab padded to a full lane width (lane-dense logit stores)
L = 2                       # decoder layers
NEG_INF = -1e30
IGNORE = -100
SCALE = 1.0 / (HD ** 0.5)


def _layer_norm(x, g, b, eps=1e-5):
    mu = jnp.mean(x, axis=-1, keepdims=True)
    var = jnp.mean((x - mu) ** 2, axis=-1, keepdims=True)
    return (x - mu) * jax.lax.rsqrt(var + eps) * g + b


def _bf16(x):
    return x.astype(jnp.bfloat16)


# ----------------------- fused per-(batch, layer) kernel -----------------------
def slam_asr_kernel(x_ref, lbl_ref,
                    ln1g_ref, ln1b_ref, wqkv_ref, bqkv_ref, wo_ref, bo_ref,
                    ln2g_ref, ln2b_ref, w1_ref, b1_ref, w2_ref, b2_ref,
                    lnfg_ref, lnfb_ref, wlm_ref,
                    logits_ref, loss_ref,
                    xres_ref):
    l = pl.program_id(1)

    # Residual stream persists in VMEM scratch across the layer ("arbitrary") grid axis.
    @pl.when(l == 0)
    def _():
        xres_ref[...] = x_ref[0]

    x = xres_ref[...]                                            # (T, D) f32

    # ---- self-attention (heads batched on a leading axis; no lane slicing) ----
    h1 = _layer_norm(x, ln1g_ref[0], ln1b_ref[0])                # (T, D) f32
    hB = jnp.broadcast_to(_bf16(h1)[None], (G, T, D))            # (3H, T, D) bf16
    qkv = jax.lax.dot_general(                                   # (3H, T, HD) f32 acc
        hB, wqkv_ref[0], (((2,), (1,)), ((0,), (0,))),
        preferred_element_type=jnp.float32) + bqkv_ref[0]
    qh = qkv[:H] * SCALE                                         # (H, T, HD) f32
    kh = qkv[H:2 * H]
    vh = qkv[2 * H:]

    rowt = jax.lax.broadcasted_iota(jnp.int32, (T, T), 0)
    colt = jax.lax.broadcasted_iota(jnp.int32, (T, T), 1)
    causal = colt <= rowt                                        # per-sequence (T, T) mask

    s = jnp.einsum('hqd,hkd->hqk', _bf16(qh), _bf16(kh),
                   preferred_element_type=jnp.float32)           # (H, T, T)
    s = jnp.where(causal[None], s, NEG_INF)
    s = s - jnp.max(s, axis=-1, keepdims=True)
    p = jnp.exp(s)
    # exact reciprocal for parity (approx=True EUP path trades ~1e-3 rel err for a free slot)
    p = p * pl.reciprocal(jnp.sum(p, axis=-1, keepdims=True), approx=False)
    o = jnp.einsum('hqk,hkd->hqd', _bf16(p), _bf16(vh),
                   preferred_element_type=jnp.float32)           # (H, T, HD)
    # per-head output projection summed over heads == concat_h(o_h) @ Wo
    # TODO(synk): at real HD (>=128) assemble a lane-dense (T, D) block and use one matmul.
    proj = jax.lax.dot_general(
        _bf16(o), wo_ref[0], (((2,), (1,)), ((0,), (0,))),
        preferred_element_type=jnp.float32)                      # (H, T, D)
    x = x + jnp.sum(proj, axis=0) + bo_ref[0]

    # ---- MLP ----
    h2 = _layer_norm(x, ln2g_ref[0], ln2b_ref[0])
    u = jnp.dot(_bf16(h2), w1_ref[0],
                preferred_element_type=jnp.float32) + b1_ref[0]  # (T, MLP) f32
    u = 0.5 * u * (1.0 + jnp.tanh(0.7978845608028654 * (u + 0.044715 * u * u * u)))
    x = x + jnp.dot(_bf16(u), w2_ref[0],
                    preferred_element_type=jnp.float32) + b2_ref[0]

    xres_ref[...] = x

    # ---- epilogue after the last layer: final LN + LM head + shifted CE ----
    @pl.when(l == L - 1)
    def _():
        hf = _layer_norm(x, lnfg_ref[...], lnfb_ref[...])
        logits = jnp.dot(_bf16(hf), wlm_ref[...],
                         preferred_element_type=jnp.float32)     # (T, VP) f32
        logits_ref[0] = logits

        # TODO(synk): at real vocab sizes (32k-128k), tile the LM head over a vocab grid
        # axis with an online max/LSE accumulator instead of a resident (T, VP) block.
        vocab = jax.lax.broadcasted_iota(jnp.int32, (T, VP), 1)
        lbl = lbl_ref[0]                                         # (T, 1) int32, pre-shifted
        lg = jnp.where(vocab < V, logits, NEG_INF)               # mask padded vocab columns
        mx = jnp.max(lg, axis=-1, keepdims=True)
        lse = mx + jnp.log(jnp.sum(jnp.exp(lg - mx), axis=-1, keepdims=True))
        picked = jnp.sum(jnp.where(vocab == lbl, logits, 0.0), axis=-1, keepdims=True)
        per_tok = lse - picked                                   # (T, 1)
        valid = lbl != IGNORE
        loss_sum = jnp.sum(jnp.where(valid, per_tok, 0.0))
        cnt = jnp.sum(valid.astype(jnp.float32))
        # lane-dense per-batch partials: lane0 = loss_sum, lane1 = valid-token count
        lane = jax.lax.broadcasted_iota(jnp.int32, (1, VP), 1)
        loss_ref[0] = jnp.where(lane == 0, loss_sum,
                                jnp.where(lane == 1, cnt, 0.0))


# ----------------------- wrapper: == SLAMASR.forward -----------------------
def slam_asr_forward(params, inputs_embeds, labels):
    """== llm(inputs_embeds=inputs_embeds, labels=labels): returns (loss, logits)."""
    x = inputs_embeds.astype(jnp.float32)                        # (B, T, D)
    # HF-style label shift on host: target for position t is labels[t+1]; last -> IGNORE.
    shifted = jnp.concatenate(
        [labels[:, 1:], jnp.full((B, 1), IGNORE, dtype=labels.dtype)], axis=1)
    shifted = shifted.reshape(B, T, 1).astype(jnp.int32)

    # one-time host-side weight prep: head-major layouts + bf16 matmul operands
    wqkv_h = _bf16(params["wqkv"].reshape(L, D, G, HD).transpose(0, 2, 1, 3))  # (L,3H,D,HD)
    bqkv_h = params["bqkv"].reshape(L, G, 1, HD)                               # (L,3H,1,HD)
    wo_h = _bf16(params["wo"].reshape(L, H, HD, D))                            # (L,H,HD,D)
    w1 = _bf16(params["w1"])
    w2 = _bf16(params["w2"])
    wlm = _bf16(jnp.pad(params["w_lm"], ((0, 0), (0, VP - V))))                # (D, VP)

    def layer_spec(*tail):       # per-layer weight slab, DMA-pipelined along grid axis 1
        nz = len(tail)
        return pl.BlockSpec((1,) + tail, lambda b, l, nz=nz: (l,) + (0,) * nz)

    def batch_spec(*tail):       # per-sequence block, grid axis 0 (parallel / megacore)
        nz = len(tail)
        return pl.BlockSpec((1,) + tail, lambda b, l, nz=nz: (b,) + (0,) * nz)

    def fixed_spec(*shape):      # small whole array, stays resident
        nz = len(shape)
        return pl.BlockSpec(shape, lambda b, l, nz=nz: (0,) * nz)

    grid_spec = pltpu.PrefetchScalarGridSpec(
        num_scalar_prefetch=0,
        grid=(B, L),
        in_specs=[
            batch_spec(T, D),                                  # inputs_embeds
            batch_spec(T, 1),                                  # shifted labels
            layer_spec(1, D), layer_spec(1, D),                # ln1 gamma / beta
            layer_spec(G, D, HD), layer_spec(G, 1, HD),        # head-major Wqkv / bqkv
            layer_spec(H, HD, D), layer_spec(1, D),            # head-major Wo / bo
            layer_spec(1, D), layer_spec(1, D),                # ln2 gamma / beta
            layer_spec(D, MLP), layer_spec(1, MLP),            # W1 / b1
            layer_spec(MLP, D), layer_spec(1, D),              # W2 / b2
            fixed_spec(1, D), fixed_spec(1, D),                # final LN gamma / beta
            fixed_spec(D, VP),                                 # LM head (vocab padded)
        ],
        out_specs=(
            batch_spec(T, VP),                                 # logits (padded vocab)
            batch_spec(1, VP),                                 # per-batch [loss_sum, cnt, 0..]
        ),
        scratch_shapes=[pltpu.VMEM((T, D), jnp.float32)],      # residual stream
    )

    logits_pad, loss_parts = pl.pallas_call(
        slam_asr_kernel,
        out_shape=(
            jax.ShapeDtypeStruct((B, T, VP), jnp.float32),
            jax.ShapeDtypeStruct((B, 1, VP), jnp.float32),
        ),
        grid_spec=grid_spec,
        compiler_params=pltpu.CompilerParams(
            dimension_semantics=("parallel", "arbitrary")),
    )(x, shifted,
      params["ln1_g"], params["ln1_b"], wqkv_h, bqkv_h, wo_h, params["bo"],
      params["ln2_g"], params["ln2_b"], w1, params["b1"], w2, params["b2"],
      params["lnf_g"], params["lnf_b"], wlm)

    logits = logits_pad[:, :, :V]
    loss_sum = jnp.sum(loss_parts[:, 0, 0])
    cnt = jnp.sum(loss_parts[:, 0, 1])
    loss = loss_sum / jnp.maximum(cnt, 1.0)   # NOTE: 0.0 (not NaN) if every label is IGNORE
    return loss, logits


# ----------------------- deterministic parameter init (conventional layout) -----------------------
def init_params(key):
    def nrm(k, shape, scale=0.02):
        return (scale * jax.random.normal(k, shape)).astype(jnp.float32)

    key, k_qkv, k_o, k_1, k_2, k_lm = jax.random.split(key, 6)
    return dict(
        ln1_g=jnp.ones((L, 1, D), jnp.float32), ln1_b=jnp.zeros((L, 1, D), jnp.float32),
        wqkv=nrm(k_qkv, (L, D, 3 * D)), bqkv=jnp.zeros((L, 1, 3 * D), jnp.float32),
        wo=nrm(k_o, (L, D, D)), bo=jnp.zeros((L, 1, D), jnp.float32),
        ln2_g=jnp.ones((L, 1, D), jnp.float32), ln2_b=jnp.zeros((L, 1, D), jnp.float32),
        w1=nrm(k_1, (L, D, MLP)), b1=jnp.zeros((L, 1, MLP), jnp.float32),
        w2=nrm(k_2, (L, MLP, D)), b2=jnp.zeros((L, 1, D), jnp.float32),
        lnf_g=jnp.ones((1, D), jnp.float32), lnf_b=jnp.zeros((1, D), jnp.float32),
        w_lm=nrm(k_lm, (D, V)),
    )


if __name__ == "__main__":
    key = jax.random.PRNGKey(0)
    k_p, k_x, k_l = jax.random.split(key, 3)
    params = init_params(k_p)

    inputs_embeds = jax.random.normal(k_x, (B, T, D), dtype=jnp.float32)
    labels = jax.random.randint(k_l, (B, T), 0, V, dtype=jnp.int32)
    labels = labels.at[:, 0].set(IGNORE)   # exercise ignore_index=-100 masking

    forward = jax.jit(slam_asr_forward)
    loss, logits = forward(params, inputs_embeds, labels)
    jax.block_until_ready((loss, logits))
    assert logits.shape == (B, T, V)
    assert bool(jnp.isfinite(loss))
    print("KERNEL_OK")
</pallas_src>

<mosaic_0001>
module attributes {stable_mosaic.version = 11 : i64} {
  func.func @slam_asr_kernel(%arg0: i32, %arg1: i32, %arg2: memref<1x8x32xf32, #tpu.memory_space<vmem>>, %arg3: memref<1x8x1xi32, #tpu.memory_space<vmem>>, %arg4: memref<1x1x32xf32, #tpu.memory_space<vmem>>, %arg5: memref<1x1x32xf32, #tpu.memory_space<vmem>>, %arg6: memref<1x12x32x8xbf16, #tpu.memory_space<vmem>>, %arg7: memref<1x12x1x8xf32, #tpu.memory_space<vmem>>, %arg8: memref<1x4x8x32xbf16, #tpu.memory_space<vmem>>, %arg9: memref<1x1x32xf32, #tpu.memory_space<vmem>>, %arg10: memref<1x1x32xf32, #tpu.memory_space<vmem>>, %arg11: memref<1x1x32xf32, #tpu.memory_space<vmem>>, %arg12: memref<1x32x64xbf16, #tpu.memory_space<vmem>>, %arg13: memref<1x1x64xf32, #tpu.memory_space<vmem>>, %arg14: memref<1x64x32xbf16, #tpu.memory_space<vmem>>, %arg15: memref<1x1x32xf32, #tpu.memory_space<vmem>>, %arg16: memref<1x32xf32, #tpu.memory_space<vmem>>, %arg17: memref<1x32xf32, #tpu.memory_space<vmem>>, %arg18: memref<32x128xbf16, #tpu.memory_space<vmem>>, %arg19: memref<1x8x128xf32, #tpu.memory_space<vmem>>, %arg20: memref<1x1x128xf32, #tpu.memory_space<vmem>>, %arg21: memref<8x32xf32, #tpu.memory_space<vmem>>) attributes {dimension_semantics = [#tpu.dimension_semantics<parallel>, #tpu.dimension_semantics<arbitrary>], iteration_bounds = array<i64: 2, 2>, scalar_prefetch = 0 : i64, scratch_operands = 1 : i64, tpu.core_type = #tpu.core_type<tc>, window_params = [{transform_indices = @transform_0, window_bounds = array<i64: 1, 8, 32>}, {transform_indices = @transform_1, window_bounds = array<i64: 1, 8, 1>}, {transform_indices = @transform_2, window_bounds = array<i64: 1, 1, 32>}, {transform_indices = @transform_3, window_bounds = array<i64: 1, 1, 32>}, {transform_indices = @transform_4, window_bounds = array<i64: 1, 12, 32, 8>}, {transform_indices = @transform_5, window_bounds = array<i64: 1, 12, 1, 8>}, {transform_indices = @transform_6, window_bounds = array<i64: 1, 4, 8, 32>}, {transform_indices = @transform_7, window_bounds = array<i64: 1, 1, 32>}, {transform_indices = @transform_8, window_bounds = array<i64: 1, 1, 32>}, {transform_indices = @transform_9, window_bounds = array<i64: 1, 1, 32>}, {transform_indices = @transform_10, window_bounds = array<i64: 1, 32, 64>}, {transform_indices = @transform_11, window_bounds = array<i64: 1, 1, 64>}, {transform_indices = @transform_12, window_bounds = array<i64: 1, 64, 32>}, {transform_indices = @transform_13, window_bounds = array<i64: 1, 1, 32>}, {pipeline_mode = #tpu.pipeline_mode<synchronous>, transform_indices = @transform_14, window_bounds = array<i64: 1, 32>}, {pipeline_mode = #tpu.pipeline_mode<synchronous>, transform_indices = @transform_15, window_bounds = array<i64: 1, 32>}, {pipeline_mode = #tpu.pipeline_mode<synchronous>, transform_indices = @transform_16, window_bounds = array<i64: 32, 128>}, {transform_indices = @transform_17, window_bounds = array<i64: 1, 8, 128>}, {transform_indices = @transform_18, window_bounds = array<i64: 1, 1, 128>}]} {
    %c0_i32 = arith.constant 0 : i32
    %0 = arith.cmpi eq, %arg1, %c0_i32 : i32
    %1 = arith.extui %0 : i1 to i32
    %c0_i32_0 = arith.constant 0 : i32
    %2 = arith.cmpi ne, %1, %c0_i32_0 : i32
    scf.if %2 {
      %c0_68 = arith.constant 0 : index
      %c0_69 = arith.constant 0 : index
      %c0_70 = arith.constant 0 : index
      %140 = vector.load %arg2[%c0_68, %c0_69, %c0_70] : memref<1x8x32xf32, #tpu.memory_space<vmem>>, vector<1x8x32xf32>
      %141 = vector.shape_cast %140 : vector<1x8x32xf32> to vector<8x32xf32>
      %c0_71 = arith.constant 0 : index
      %c0_72 = arith.constant 0 : index
      %142 = vector.load %arg21[%c0_71, %c0_72] : memref<8x32xf32, #tpu.memory_space<vmem>>, vector<8x32xf32>
      tpu.vector_store %arg21[%c0_71, %c0_72], %141 {strides = array<i32>} : memref<8x32xf32, #tpu.memory_space<vmem>>, vector<8x32xf32>,
    } else {
    }
    %c0 = arith.constant 0 : index
    %c0_1 = arith.constant 0 : index
    %3 = vector.load %arg21[%c0, %c0_1] : memref<8x32xf32, #tpu.memory_space<vmem>>, vector<8x32xf32>
    %c0_2 = arith.constant 0 : index
    %c0_3 = arith.constant 0 : index
    %c0_4 = arith.constant 0 : index
    %4 = vector.load %arg4[%c0_2, %c0_3, %c0_4] : memref<1x1x32xf32, #tpu.memory_space<vmem>>, vector<1x1x32xf32>
    %5 = vector.shape_cast %4 : vector<1x1x32xf32> to vector<1x32xf32>
    %c0_5 = arith.constant 0 : index
    %c0_6 = arith.constant 0 : index
    %c0_7 = arith.constant 0 : index
    %6 = vector.load %arg5[%c0_5, %c0_6, %c0_7] : memref<1x1x32xf32, #tpu.memory_space<vmem>>, vector<1x1x32xf32>
    %7 = vector.shape_cast %6 : vector<1x1x32xf32> to vector<1x32xf32>
    %cst = arith.constant dense<0.000000e+00> : vector<8xf32>
    %8 = vector.multi_reduction <add>, %3, %cst [1] : vector<8x32xf32> to vector<8xf32>
    %9 = vector.shape_cast %8 : vector<8xf32> to vector<8x1xf32>
    %cst_8 = arith.constant 3.200000e+01 : f32
    %10 = vector.broadcast %cst_8 : f32 to vector<8x1xf32>
    %11 = arith.divf %9, %10 : vector<8x1xf32>
    %12 = vector.broadcast %11 : vector<8x1xf32> to vector<8x32xf32>
    %13 = arith.subf %3, %12 : vector<8x32xf32>
    %14 = arith.mulf %13, %13 : vector<8x32xf32>
    %cst_9 = arith.constant dense<0.000000e+00> : vector<8xf32>
    %15 = vector.multi_reduction <add>, %14, %cst_9 [1] : vector<8x32xf32> to vector<8xf32>
    %16 = vector.shape_cast %15 : vector<8xf32> to vector<8x1xf32>
    %cst_10 = arith.constant 3.200000e+01 : f32
    %17 = vector.broadcast %cst_10 : f32 to vector<8x1xf32>
    %18 = arith.divf %16, %17 : vector<8x1xf32>
    %19 = vector.broadcast %11 : vector<8x1xf32> to vector<8x32xf32>
    %20 = arith.subf %3, %19 : vector<8x32xf32>
    %cst_11 = arith.constant 9.99999974E-6 : f32
    %21 = vector.broadcast %cst_11 : f32 to vector<8x1xf32>
    %22 = arith.addf %18, %21 : vector<8x1xf32>
    %23 = math.rsqrt %22 : vector<8x1xf32>
    %24 = vector.broadcast %23 : vector<8x1xf32> to vector<8x32xf32>
    %25 = arith.mulf %20, %24 : vector<8x32xf32>
    %26 = vector.broadcast %5 : vector<1x32xf32> to vector<8x32xf32>
    %27 = arith.mulf %25, %26 : vector<8x32xf32>
    %28 = vector.broadcast %7 : vector<1x32xf32> to vector<8x32xf32>
    %29 = arith.addf %27, %28 : vector<8x32xf32>
    %30 = arith.truncf %29 : vector<8x32xf32> to vector<8x32xbf16>
    %31 = vector.shape_cast %30 : vector<8x32xbf16> to vector<1x8x32xbf16>
    %32 = vector.shape_cast %31 : vector<1x8x32xbf16> to vector<1x8x32xbf16>
    %33 = vector.broadcast %32 : vector<1x8x32xbf16> to vector<12x8x32xbf16>
    %c0_12 = arith.constant 0 : index
    %c0_13 = arith.constant 0 : index
    %c0_14 = arith.constant 0 : index
    %c0_15 = arith.constant 0 : index
    %34 = vector.load %arg6[%c0_12, %c0_13, %c0_14, %c0_15] : memref<1x12x32x8xbf16, #tpu.memory_space<vmem>>, vector<1x12x32x8xbf16>
    %35 = vector.shape_cast %34 : vector<1x12x32x8xbf16> to vector<12x32x8xbf16>
    %cst_16 = arith.constant dense<0.000000e+00> : vector<12x8x8xf32>
    %36 = tpu.matmul %33, %35, %cst_16 {dimension_numbers = #tpu.dot_dimension_numbers<[2], [1], [1], [2], [0, 0, 0, 1, 1, 2], [0], [0]>} : vector<12x8x32xbf16>, vector<12x32x8xbf16>, vector<12x8x8xf32> -> vector<12x8x8xf32>
    %c0_17 = arith.constant 0 : index
    %c0_18 = arith.constant 0 : index
    %c0_19 = arith.constant 0 : index
    %c0_20 = arith.constant 0 : index
    %37 = vector.load %arg7[%c0_17, %c0_18, %c0_19, %c0_20] : memref<1x12x1x8xf32, #tpu.memory_space<vmem>>, vector<1x12x1x8xf32>
    %38 = vector.shape_cast %37 : vector<1x12x1x8xf32> to vector<12x1x8xf32>
    %39 = vector.broadcast %38 : vector<12x1x8xf32> to vector<12x8x8xf32>
    %40 = arith.addf %36, %39 : vector<12x8x8xf32>
    %41 = vector.extract_strided_slice %40 {offsets = [0, 0, 0], sizes = [4, 8, 8], strides = [1, 1, 1]} : vector<12x8x8xf32> to vector<4x8x8xf32>
    %cst_21 = arith.constant 0.353553385 : f32
    %42 = vector.broadcast %cst_21 : f32 to vector<4x8x8xf32>
    %43 = arith.mulf %41, %42 : vector<4x8x8xf32>
    %44 = vector.extract_strided_slice %40 {offsets = [4, 0, 0], sizes = [4, 8, 8], strides = [1, 1, 1]} : vector<12x8x8xf32> to vector<4x8x8xf32>
    %45 = vector.extract_strided_slice %40 {offsets = [8, 0, 0], sizes = [4, 8, 8], strides = [1, 1, 1]} : vector<12x8x8xf32> to vector<4x8x8xf32>
    %46 = tpu.iota {dimensions = array<i32: 0>} : vector<8x8xi32>
    %47 = tpu.iota {dimensions = array<i32: 1>} : vector<8x8xi32>
    %48 = arith.cmpi sle, %47, %46 : vector<8x8xi32>
    %49 = arith.truncf %43 : vector<4x8x8xf32> to vector<4x8x8xbf16>
    %50 = arith.truncf %44 : vector<4x8x8xf32> to vector<4x8x8xbf16>
    "tpu.trace_start"() <{level = 10 : i32, message = "hqd,hkd->hqk"}> : () -> ()
    %cst_22 = arith.constant dense<0.000000e+00> : vector<4x8x8xf32>
    %51 = tpu.matmul %49, %50, %cst_22 {dimension_numbers = #tpu.dot_dimension_numbers<[2], [2], [1], [1], [0, 0, 0, 1, 1, 1], [0], [0]>} : vector<4x8x8xbf16>, vector<4x8x8xbf16>, vector<4x8x8xf32> -> vector<4x8x8xf32>
    "tpu.trace_stop"() : () -> ()
    %52 = vector.shape_cast %48 : vector<8x8xi1> to vector<1x8x8xi1>
    %cst_23 = arith.constant -1.000000e+30 : f32
    %53 = vector.shape_cast %52 : vector<1x8x8xi1> to vector<1x8x8xi1>
    %54 = vector.broadcast %53 : vector<1x8x8xi1> to vector<4x8x8xi1>
    %55 = vector.broadcast %cst_23 : f32 to vector<4x8x8xf32>
    %56 = arith.select %54, %51, %55 : vector<4x8x8xi1>, vector<4x8x8xf32>
    %cst_24 = arith.constant dense<0xFF800000> : vector<4x8xf32>
    %57 = vector.multi_reduction <maximumf>, %56, %cst_24 [2] : vector<4x8x8xf32> to vector<4x8xf32>
    %58 = vector.shape_cast %57 : vector<4x8xf32> to vector<4x8x1xf32>
    %59 = vector.broadcast %58 : vector<4x8x1xf32> to vector<4x8x8xf32>
    %60 = arith.subf %56, %59 : vector<4x8x8xf32>
    %61 = math.exp %60 : vector<4x8x8xf32>
    %cst_25 = arith.constant dense<0.000000e+00> : vector<4x8xf32>
    %62 = vector.multi_reduction <add>, %61, %cst_25 [2] : vector<4x8x8xf32> to vector<4x8xf32>
    %63 = vector.shape_cast %62 : vector<4x8xf32> to vector<4x8x1xf32>
    %64 = tpu.reciprocal %63 : vector<4x8x1xf32> -> vector<4x8x1xf32>
    %65 = vector.broadcast %64 : vector<4x8x1xf32> to vector<4x8x8xf32>
    %66 = arith.mulf %61, %65 : vector<4x8x8xf32>
    %67 = arith.truncf %66 : vector<4x8x8xf32> to vector<4x8x8xbf16>
    %68 = arith.truncf %45 : vector<4x8x8xf32> to vector<4x8x8xbf16>
    "tpu.trace_start"() <{level = 10 : i32, message = "hqk,hkd->hqd"}> : () -> ()
    %cst_26 = arith.constant dense<0.000000e+00> : vector<4x8x8xf32>
    %69 = tpu.matmul %67, %68, %cst_26 {dimension_numbers = #tpu.dot_dimension_numbers<[2], [1], [1], [2], [0, 0, 0, 1, 1, 2], [0], [0]>} : vector<4x8x8xbf16>, vector<4x8x8xbf16>, vector<4x8x8xf32> -> vector<4x8x8xf32>
    "tpu.trace_stop"() : () -> ()
    %70 = arith.truncf %69 : vector<4x8x8xf32> to vector<4x8x8xbf16>
    %c0_27 = arith.constant 0 : index
    %c0_28 = arith.constant 0 : index
    %c0_29 = arith.constant 0 : index
    %c0_30 = arith.constant 0 : index
    %71 = vector.load %arg8[%c0_27, %c0_28, %c0_29, %c0_30] : memref<1x4x8x32xbf16, #tpu.memory_space<vmem>>, vector<1x4x8x32xbf16>
    %72 = vector.shape_cast %71 : vector<1x4x8x32xbf16> to vector<4x8x32xbf16>
    %cst_31 = arith.constant dense<0.000000e+00> : vector<4x8x32xf32>
    %73 = tpu.matmul %70, %72, %cst_31 {dimension_numbers = #tpu.dot_dimension_numbers<[2], [1], [1], [2], [0, 0, 0, 1, 1, 2], [0], [0]>} : vector<4x8x8xbf16>, vector<4x8x32xbf16>, vector<4x8x32xf32> -> vector<4x8x32xf32>
    %cst_32 = arith.constant dense<0.000000e+00> : vector<8x32xf32>
    %74 = vector.multi_reduction <add>, %73, %cst_32 [0] : vector<4x8x32xf32> to vector<8x32xf32>
    %75 = arith.addf %3, %74 : vector<8x32xf32>
    %c0_33 = arith.constant 0 : index
    %c0_34 = arith.constant 0 : index
    %c0_35 = arith.constant 0 : index
    %76 = vector.load %arg9[%c0_33, %c0_34, %c0_35] : memref<1x1x32xf32, #tpu.memory_space<vmem>>, vector<1x1x32xf32>
    %77 = vector.shape_cast %76 : vector<1x1x32xf32> to vector<1x32xf32>
    %78 = vector.broadcast %77 : vector<1x32xf32> to vector<8x32xf32>
    %79 = arith.addf %75, %78 : vector<8x32xf32>
    %c0_36 = arith.constant 0 : index
    %c0_37 = arith.constant 0 : index
    %c0_38 = arith.constant 0 : index
    %80 = vector.load %arg10[%c0_36, %c0_37, %c0_38] : memref<1x1x32xf32, #tpu.memory_space<vmem>>, vector<1x1x32xf32>
    %81 = vector.shape_cast %80 : vector<1x1x32xf32> to vector<1x32xf32>
    %c0_39 = arith.constant 0 : index
    %c0_40 = arith.constant 0 : index
    %c0_41 = arith.constant 0 : index
    %82 = vector.load %arg11[%c0_39, %c0_40, %c0_41] : memref<1x1x32xf32, #tpu.memory_space<vmem>>, vector<1x1x32xf32>
    %83 = vector.shape_cast %82 : vector<1x1x32xf32> to vector<1x32xf32>
    %cst_42 = arith.constant dense<0.000000e+00> : vector<8xf32>
    %84 = vector.multi_reduction <add>, %79, %cst_42 [1] : vector<8x32xf32> to vector<8xf32>
    %85 = vector.shape_cast %84 : vector<8xf32> to vector<8x1xf32>
    %cst_43 = arith.constant 3.200000e+01 : f32
    %86 = vector.broadcast %cst_43 : f32 to vector<8x1xf32>
    %87 = arith.divf %85, %86 : vector<8x1xf32>
    %88 = vector.broadcast %87 : vector<8x1xf32> to vector<8x32xf32>
    %89 = arith.subf %79, %88 : vector<8x32xf32>
    %90 = arith.mulf %89, %89 : vector<8x32xf32>
    %cst_44 = arith.constant dense<0.000000e+00> : vector<8xf32>
    %91 = vector.multi_reduction <add>, %90, %cst_44 [1] : vector<8x32xf32> to vector<8xf32>
    %92 = vector.shape_cast %91 : vector<8xf32> to vector<8x1xf32>
    %cst_45 = arith.constant 3.200000e+01 : f32
    %93 = vector.broadcast %cst_45 : f32 to vector<8x1xf32>
    %94 = arith.divf %92, %93 : vector<8x1xf32>
    %95 = vector.broadcast %87 : vector<8x1xf32> to vector<8x32xf32>
    %96 = arith.subf %79, %95 : vector<8x32xf32>
    %cst_46 = arith.constant 9.99999974E-6 : f32
    %97 = vector.broadcast %cst_46 : f32 to vector<8x1xf32>
    %98 = arith.addf %94, %97 : vector<8x1xf32>
    %99 = math.rsqrt %98 : vector<8x1xf32>
    %100 = vector.broadcast %99 : vector<8x1xf32> to vector<8x32xf32>
    %101 = arith.mulf %96, %100 : vector<8x32xf32>
    %102 = vector.broadcast %81 : vector<1x32xf32> to vector<8x32xf32>
    %103 = arith.mulf %101, %102 : vector<8x32xf32>
    %104 = vector.broadcast %83 : vector<1x32xf32> to vector<8x32xf32>
    %105 = arith.addf %103, %104 : vector<8x32xf32>
    %106 = arith.truncf %105 : vector<8x32xf32> to vector<8x32xbf16>
    %c0_47 = arith.constant 0 : index
    %c0_48 = arith.constant 0 : index
    %c0_49 = arith.constant 0 : index
    %107 = vector.load %arg12[%c0_47, %c0_48, %c0_49] : memref<1x32x64xbf16, #tpu.memory_space<vmem>>, vector<1x32x64xbf16>
    %108 = vector.shape_cast %107 : vector<1x32x64xbf16> to vector<32x64xbf16>
    %cst_50 = arith.constant dense<0.000000e+00> : vector<8x64xf32>
    %109 = tpu.matmul %106, %108, %cst_50 {dimension_numbers = #tpu.dot_dimension_numbers<[1], [0], [0], [1], [0, 0, 1, 1], [], []>} : vector<8x32xbf16>, vector<32x64xbf16>, vector<8x64xf32> -> vector<8x64xf32>
    %c0_51 = arith.constant 0 : index
    %c0_52 = arith.constant 0 : index
    %c0_53 = arith.constant 0 : index
    %110 = vector.load %arg13[%c0_51, %c0_52, %c0_53] : memref<1x1x64xf32, #tpu.memory_space<vmem>>, vector<1x1x64xf32>
    %111 = vector.shape_cast %110 : vector<1x1x64xf32> to vector<1x64xf32>
    %112 = vector.broadcast %111 : vector<1x64xf32> to vector<8x64xf32>
    %113 = arith.addf %109, %112 : vector<8x64xf32>
    %cst_54 = arith.constant 5.000000e-01 : f32
    %114 = vector.broadcast %cst_54 : f32 to vector<8x64xf32>
    %115 = arith.mulf %114, %113 : vector<8x64xf32>
    %cst_55 = arith.constant 4.471500e-02 : f32
    %116 = vector.broadcast %cst_55 : f32 to vector<8x64xf32>
    %117 = arith.mulf %116, %113 : vector<8x64xf32>
    %118 = arith.mulf %117, %113 : vector<8x64xf32>
    %119 = arith.mulf %118, %113 : vector<8x64xf32>
    %120 = arith.addf %113, %119 : vector<8x64xf32>
    %cst_56 = arith.constant 0.797884583 : f32
    %121 = vector.broadcast %cst_56 : f32 to vector<8x64xf32>
    %122 = arith.mulf %121, %120 : vector<8x64xf32>
    %123 = math.tanh %122 : vector<8x64xf32>
    %cst_57 = arith.constant 1.000000e+00 : f32
    %124 = vector.broadcast %cst_57 : f32 to vector<8x64xf32>
    %125 = arith.addf %124, %123 : vector<8x64xf32>
    %126 = arith.mulf %115, %125 : vector<8x64xf32>
    %127 = arith.truncf %126 : vector<8x64xf32> to vector<8x64xbf16>
    %c0_58 = arith.constant 0 : index
    %c0_59 = arith.constant 0 : index
    %c0_60 = arith.constant 0 : index
    %128 = vector.load %arg14[%c0_58, %c0_59, %c0_60] : memref<1x64x32xbf16, #tpu.memory_space<vmem>>, vector<1x64x32xbf16>
    %129 = vector.shape_cast %128 : vector<1x64x32xbf16> to vector<64x32xbf16>
    %cst_61 = arith.constant dense<0.000000e+00> : vector<8x32xf32>
    %130 = tpu.matmul %127, %129, %cst_61 {dimension_numbers = #tpu.dot_dimension_numbers<[1], [0], [0], [1], [0, 0, 1, 1], [], []>} : vector<8x64xbf16>, vector<64x32xbf16>, vector<8x32xf32> -> vector<8x32xf32>
    %131 = arith.addf %79, %130 : vector<8x32xf32>
    %c0_62 = arith.constant 0 : index
    %c0_63 = arith.constant 0 : index
    %c0_64 = arith.constant 0 : index
    %132 = vector.load %arg15[%c0_62, %c0_63, %c0_64] : memref<1x1x32xf32, #tpu.memory_space<vmem>>, vector<1x1x32xf32>
    %133 = vector.shape_cast %132 : vector<1x1x32xf32> to vector<1x32xf32>
    %134 = vector.broadcast %133 : vector<1x32xf32> to vector<8x32xf32>
    %135 = arith.addf %131, %134 : vector<8x32xf32>
    %c0_65 = arith.constant 0 : index
    %c0_66 = arith.constant 0 : index
    %136 = vector.load %arg21[%c0_65, %c0_66] : memref<8x32xf32, #tpu.memory_space<vmem>>, vector<8x32xf32>
    tpu.vector_store %arg21[%c0_65, %c0_66], %135 {strides = array<i32>} : memref<8x32xf32, #tpu.memory_space<vmem>>, vector<8x32xf32>,
    %c1_i32 = arith.constant 1 : i32
    %137 = arith.cmpi eq, %arg1, %c1_i32 : i32
    %138 = arith.extui %137 : i1 to i32
    %c0_i32_67 = arith.constant 0 : i32
    %139 = arith.cmpi ne, %138, %c0_i32_67 : i32
    scf.if %139 {
      %c0_68 = arith.constant 0 : index
      %c0_69 = arith.constant 0 : index
      %140 = vector.load %arg16[%c0_68, %c0_69] : memref<1x32xf32, #tpu.memory_space<vmem>>, vector<1x32xf32>
      %c0_70 = arith.constant 0 : index
      %c0_71 = arith.constant 0 : index
      %141 = vector.load %arg17[%c0_70, %c0_71] : memref<1x32xf32, #tpu.memory_space<vmem>>, vector<1x32xf32>
      %cst_72 = arith.constant dense<0.000000e+00> : vector<8xf32>
      %142 = vector.multi_reduction <add>, %135, %cst_72 [1] : vector<8x32xf32> to vector<8xf32>
      %143 = vector.shape_cast %142 : vector<8xf32> to vector<8x1xf32>
      %cst_73 = arith.constant 3.200000e+01 : f32
      %144 = vector.broadcast %cst_73 : f32 to vector<8x1xf32>
      %145 = arith.divf %143, %144 : vector<8x1xf32>
      %146 = vector.broadcast %145 : vector<8x1xf32> to vector<8x32xf32>
      %147 = arith.subf %135, %146 : vector<8x32xf32>
      %148 = arith.mulf %147, %147 : vector<8x32xf32>
      %cst_74 = arith.constant dense<0.000000e+00> : vector<8xf32>
      %149 = vector.multi_reduction <add>, %148, %cst_74 [1] : vector<8x32xf32> to vector<8xf32>
      %150 = vector.shape_cast %149 : vector<8xf32> to vector<8x1xf32>
      %cst_75 = arith.constant 3.200000e+01 : f32
      %151 = vector.broadcast %cst_75 : f32 to vector<8x1xf32>
      %152 = arith.divf %150, %151 : vector<8x1xf32>
      %153 = vector.broadcast %145 : vector<8x1xf32> to vector<8x32xf32>
      %154 = arith.subf %135, %153 : vector<8x32xf32>
      %cst_76 = arith.constant 9.99999974E-6 : f32
      %155 = vector.broadcast %cst_76 : f32 to vector<8x1xf32>
      %156 = arith.addf %152, %155 : vector<8x1xf32>
      %157 = math.rsqrt %156 : vector<8x1xf32>
      %158 = vector.broadcast %157 : vector<8x1xf32> to vector<8x32xf32>
      %159 = arith.mulf %154, %158 : vector<8x32xf32>
      %160 = vector.broadcast %140 : vector<1x32xf32> to vector<8x32xf32>
      %161 = arith.mulf %159, %160 : vector<8x32xf32>
      %162 = vector.broadcast %141 : vector<1x32xf32> to vector<8x32xf32>
      %163 = arith.addf %161, %162 : vector<8x32xf32>
      %164 = arith.truncf %163 : vector<8x32xf32> to vector<8x32xbf16>
      %c0_77 = arith.constant 0 : index
      %c0_78 = arith.constant 0 : index
      %165 = vector.load %arg18[%c0_77, %c0_78] : memref<32x128xbf16, #tpu.memory_space<vmem>>, vector<32x128xbf16>
      %cst_79 = arith.constant dense<0.000000e+00> : vector<8x128xf32>
      %166 = tpu.matmul %164, %165, %cst_79 {dimension_numbers = #tpu.dot_dimension_numbers<[1], [0], [0], [1], [0, 0, 1, 1], [], []>} : vector<8x32xbf16>, vector<32x128xbf16>, vector<8x128xf32> -> vector<8x128xf32>
      %c0_80 = arith.constant 0 : index
      %c0_81 = arith.constant 0 : index
      %c0_82 = arith.constant 0 : index
      %167 = vector.load %arg19[%c0_80, %c0_81, %c0_82] : memref<1x8x128xf32, #tpu.memory_space<vmem>>, vector<1x8x128xf32>
      %168 = vector.shape_cast %167 : vector<1x8x128xf32> to vector<8x128xf32>
      %169 = vector.shape_cast %166 : vector<8x128xf32> to vector<1x8x128xf32>
      tpu.vector_store %arg19[%c0_80, %c0_81, %c0_82], %169 {strides = array<i32>} : memref<1x8x128xf32, #tpu.memory_space<vmem>>, vector<1x8x128xf32>,
      %170 = tpu.iota {dimensions = array<i32: 1>} : vector<8x128xi32>
      %c0_83 = arith.constant 0 : index
      %c0_84 = arith.constant 0 : index
      %c0_85 = arith.constant 0 : index
      %171 = vector.load %arg3[%c0_83, %c0_84, %c0_85] : memref<1x8x1xi32, #tpu.memory_space<vmem>>, vector<1x8x1xi32>
      %172 = vector.shape_cast %171 : vector<1x8x1xi32> to vector<8x1xi32>
      %c64_i32 = arith.constant 64 : i32
      %173 = vector.broadcast %c64_i32 : i32 to vector<8x128xi32>
      %174 = arith.cmpi slt, %170, %173 : vector<8x128xi32>
      %cst_86 = arith.constant -1.000000e+30 : f32
      %175 = vector.broadcast %cst_86 : f32 to vector<8x128xf32>
      %176 = arith.select %174, %166, %175 : vector<8x128xi1>, vector<8x128xf32>
      %cst_87 = arith.constant dense<0xFF800000> : vector<8xf32>
      %177 = vector.multi_reduction <maximumf>, %176, %cst_87 [1] : vector<8x128xf32> to vector<8xf32>
      %178 = vector.shape_cast %177 : vector<8xf32> to vector<8x1xf32>
      %179 = vector.broadcast %178 : vector<8x1xf32> to vector<8x128xf32>
      %180 = arith.subf %176, %179 : vector<8x128xf32>
      %181 = math.exp %180 : vector<8x128xf32>
      %cst_88 = arith.constant dense<0.000000e+00> : vector<8xf32>
      %182 = vector.multi_reduction <add>, %181, %cst_88 [1] : vector<8x128xf32> to vector<8xf32>
      %183 = vector.shape_cast %182 : vector<8xf32> to vector<8x1xf32>
      %184 = math.log %183 : vector<8x1xf32>
      %185 = arith.addf %178, %184 : vector<8x1xf32>
      %186 = vector.broadcast %172 : vector<8x1xi32> to vector<8x128xi32>
      %187 = arith.cmpi eq, %170, %186 : vector<8x128xi32>
      %cst_89 = arith.constant 0.000000e+00 : f32
      %188 = vector.broadcast %cst_89 : f32 to vector<8x128xf32>
      %189 = arith.select %187, %166, %188 : vector<8x128xi1>, vector<8x128xf32>
      %cst_90 = arith.constant dense<0.000000e+00> : vector<8xf32>
      %190 = vector.multi_reduction <add>, %189, %cst_90 [1] : vector<8x128xf32> to vector<8xf32>
      %191 = vector.shape_cast %190 : vector<8xf32> to vector<8x1xf32>
      %192 = arith.subf %185, %191 : vector<8x1xf32>
      %c-100_i32 = arith.constant -100 : i32
      %193 = vector.broadcast %c-100_i32 : i32 to vector<8x1xi32>
      %194 = arith.cmpi ne, %172, %193 : vector<8x1xi32>
      %cst_91 = arith.constant 0.000000e+00 : f32
      %195 = vector.broadcast %cst_91 : f32 to vector<8x1xf32>
      %196 = arith.select %194, %192, %195 : vector<8x1xi1>, vector<8x1xf32>
      %197 = vector.shape_cast %196 : vector<8x1xf32> to vector<1x8x1xf32>
      %cst_92 = arith.constant dense<0.000000e+00> : vector<1xf32>
      %198 = vector.multi_reduction <add>, %197, %cst_92 [1, 2] : vector<1x8x1xf32> to vector<1xf32>
      %199 = vector.shape_cast %198 : vector<1xf32> to vector<1x1x1xf32>
      %200 = vector.extract %199[0, 0, 0] : f32 from vector<1x1x1xf32>
      %201 = arith.extui %194 : vector<8x1xi1> to vector<8x1xi32>
      %202 = arith.sitofp %201 : vector<8x1xi32> to vector<8x1xf32>
      %203 = vector.shape_cast %202 : vector<8x1xf32> to vector<1x8x1xf32>
      %cst_93 = arith.constant dense<0.000000e+00> : vector<1xf32>
      %204 = vector.multi_reduction <add>, %203, %cst_93 [1, 2] : vector<1x8x1xf32> to vector<1xf32>
      %205 = vector.shape_cast %204 : vector<1xf32> to vector<1x1x1xf32>
      %206 = vector.extract %205[0, 0, 0] : f32 from vector<1x1x1xf32>
      %207 = tpu.iota {dimensions = array<i32: 1>} : vector<1x128xi32>
      %c0_i32_94 = arith.constant 0 : i32
      %208 = vector.broadcast %c0_i32_94 : i32 to vector<1x128xi32>
      %209 = arith.cmpi eq, %207, %208 : vector<1x128xi32>
      %c1_i32_95 = arith.constant 1 : i32
      %210 = vector.broadcast %c1_i32_95 : i32 to vector<1x128xi32>
      %211 = arith.cmpi eq, %207, %210 : vector<1x128xi32>
      %cst_96 = arith.constant 0.000000e+00 : f32
      %212 = vector.broadcast %206 : f32 to vector<1x128xf32>
      %213 = vector.broadcast %cst_96 : f32 to vector<1x128xf32>
      %214 = arith.select %211, %212, %213 : vector<1x128xi1>, vector<1x128xf32>
      %215 = vector.broadcast %200 : f32 to vector<1x128xf32>
      %216 = arith.select %209, %215, %214 : vector<1x128xi1>, vector<1x128xf32>
      %c0_97 = arith.constant 0 : index
      %c0_98 = arith.constant 0 : index
      %c0_99 = arith.constant 0 : index
      %217 = vector.load %arg20[%c0_97, %c0_98, %c0_99] : memref<1x1x128xf32, #tpu.memory_space<vmem>>, vector<1x1x128xf32>
      %218 = vector.shape_cast %217 : vector<1x1x128xf32> to vector<1x128xf32>
      %219 = vector.shape_cast %216 : vector<1x128xf32> to vector<1x1x128xf32>
      tpu.vector_store %arg20[%c0_97, %c0_98, %c0_99], %219 {strides = array<i32>} : memref<1x1x128xf32, #tpu.memory_space<vmem>>, vector<1x1x128xf32>,
    } else {
    }
    return
  }
  func.func @transform_0(%arg0: i32, %arg1: i32) -> (i32, i32, i32) {
    %c0_i32 = arith.constant 0 : i32
    %c0_i32_0 = arith.constant 0 : i32
    %c0_i32_1 = arith.constant 0 : i32
    return %arg0, %c0_i32, %c0_i32_0 : i32, i32, i32
  }
  func.func @transform_1(%arg0: i32, %arg1: i32) -> (i32, i32, i32) {
    %c0_i32 = arith.constant 0 : i32
    %c0_i32_0 = arith.constant 0 : i32
    %c0_i32_1 = arith.constant 0 : i32
    return %arg0, %c0_i32, %c0_i32_0 : i32, i32, i32
  }
  func.func @transform_2(%arg0: i32, %arg1: i32) -> (i32, i32, i32) {
    %c0_i32 = arith.constant 0 : i32
    %c0_i32_0 = arith.constant 0 : i32
    %c0_i32_1 = arith.constant 0 : i32
    return %arg1, %c0_i32, %c0_i32_0 : i32, i32, i32
  }
  func.func @transform_3(%arg0: i32, %arg1: i32) -> (i32, i32, i32) {
    %c0_i32 = arith.constant 0 : i32
    %c0_i32_0 = arith.constant 0 : i32
    %c0_i32_1 = arith.constant 0 : i32
    return %arg1, %c0_i32, %c0_i32_0 : i32, i32, i32
  }
  func.func @transform_4(%arg0: i32, %arg1: i32) -> (i32, i32, i32, i32) {
    %c0_i32 = arith.constant 0 : i32
    %c0_i32_0 = arith.constant 0 : i32
    %c0_i32_1 = arith.constant 0 : i32
    %c0_i32_2 = arith.constant 0 : i32
    return %arg1, %c0_i32, %c0_i32_0, %c0_i32_1 : i32, i32, i32, i32
  }
  func.func @transform_5(%arg0: i32, %arg1: i32) -> (i32, i32, i32, i32) {
    %c0_i32 = arith.constant 0 : i32
    %c0_i32_0 = arith.constant 0 : i32
    %c0_i32_1 = arith.constant 0 : i32
    %c0_i32_2 = arith.constant 0 : i32
    return %arg1, %c0_i32, %c0_i32_0, %c0_i32_1 : i32, i32, i32, i32
  }
  func.func @transform_6(%arg0: i32, %arg1: i32) -> (i32, i32, i32, i32) {
    %c0_i32 = arith.constant 0 : i32
    %c0_i32_0 = arith.constant 0 : i32
    %c0_i32_1 = arith.constant 0 : i32
    %c0_i32_2 = arith.constant 0 : i32
    return %arg1, %c0_i32, %c0_i32_0, %c0_i32_1 : i32, i32, i32, i32
  }
  func.func @transform_7(%arg0: i32, %arg1: i32) -> (i32, i32, i32) {
    %c0_i32 = arith.constant 0 : i32
    %c0_i32_0 = arith.constant 0 : i32
    %c0_i32_1 = arith.constant 0 : i32
    return %arg1, %c0_i32, %c0_i32_0 : i32, i32, i32
  }
  func.func @transform_8(%arg0: i32, %arg1: i32) -> (i32, i32, i32) {
    %c0_i32 = arith.constant 0 : i32
    %c0_i32_0 = arith.constant 0 : i32
    %c0_i32_1 = arith.constant 0 : i32
    return %arg1, %c0_i32, %c0_i32_0 : i32, i32, i32
  }
  func.func @transform_9(%arg0: i32, %arg1: i32) -> (i32, i32, i32) {
    %c0_i32 = arith.constant 0 : i32
    %c0_i32_0 = arith.constant 0 : i32
    %c0_i32_1 = arith.constant 0 : i32
    return %arg1, %c0_i32, %c0_i32_0 : i32, i32, i32
  }
  func.func @transform_10(%arg0: i32, %arg1: i32) -> (i32, i32, i32) {
    %c0_i32 = arith.constant 0 : i32
    %c0_i32_0 = arith.constant 0 : i32
    %c0_i32_1 = arith.constant 0 : i32
    return %arg1, %c0_i32, %c0_i32_0 : i32, i32, i32
  }
  func.func @transform_11(%arg0: i32, %arg1: i32) -> (i32, i32, i32) {
    %c0_i32 = arith.constant 0 : i32
    %c0_i32_0 = arith.constant 0 : i32
    %c0_i32_1 = arith.constant 0 : i32
    return %arg1, %c0_i32, %c0_i32_0 : i32, i32, i32
  }
  func.func @transform_12(%arg0: i32, %arg1: i32) -> (i32, i32, i32) {
    %c0_i32 = arith.constant 0 : i32
    %c0_i32_0 = arith.constant 0 : i32
    %c0_i32_1 = arith.constant 0 : i32
    return %arg1, %c0_i32, %c0_i32_0 : i32, i32, i32
  }
  func.func @transform_13(%arg0: i32, %arg1: i32) -> (i32, i32, i32) {
    %c0_i32 = arith.constant 0 : i32
    %c0_i32_0 = arith.constant 0 : i32
    %c0_i32_1 = arith.constant 0 : i32
    return %arg1, %c0_i32, %c0_i32_0 : i32, i32, i32
  }
  func.func @transform_14(%arg0: i32, %arg1: i32) -> (i32, i32) {
    %c0_i32 = arith.constant 0 : i32
    %c0_i32_0 = arith.constant 0 : i32
    %c0_i32_1 = arith.constant 0 : i32
    return %c0_i32, %c0_i32_0 : i32, i32
  }
  func.func @transform_15(%arg0: i32, %arg1: i32) -> (i32, i32) {
    %c0_i32 = arith.constant 0 : i32
    %c0_i32_0 = arith.constant 0 : i32
    %c0_i32_1 = arith.constant 0 : i32
    return %c0_i32, %c0_i32_0 : i32, i32
  }
  func.func @transform_16(%arg0: i32, %arg1: i32) -> (i32, i32) {
    %c0_i32 = arith.constant 0 : i32
    %c0_i32_0 = arith.constant 0 : i32
    %c0_i32_1 = arith.constant 0 : i32
    return %c0_i32, %c0_i32_0 : i32, i32
  }
  func.func @transform_17(%arg0: i32, %arg1: i32) -> (i32, i32, i32) {
    %c0_i32 = arith.constant 0 : i32
    %c0_i32_0 = arith.constant 0 : i32
    %c0_i32_1 = arith.constant 0 : i32
    return %arg0, %c0_i32, %c0_i32_0 : i32, i32, i32
  }
  func.func @transform_18(%arg0: i32, %arg1: i32) -> (i32, i32, i32) {
    %c0_i32 = arith.constant 0 : i32
    %c0_i32_0 = arith.constant 0 : i32
    %c0_i32_1 = arith.constant 0 : i32
    return %arg0, %c0_i32, %c0_i32_0 : i32, i32, i32
  }
}

</mosaic_0001>

<bundles_post_ra>
// kernel: slam_asr_forward.1
= control target key start
LH: loop header
LB: loop body
LE: loop exit
PB: predicated region body
PF: predicated region fallthrough
CT: control target
= control target key end

     0   :  { %s3069_s0 = inlined_call_operand.vmem [shape: f32[2,8,32], index: 0, kind: input, shape index: {}]   ;;  %s3070_s1 = inlined_call_operand.vmem [shape: s32[2,8,1], index: 1, kind: input, shape index: {}]   ;;  %s3071_s2 = inlined_call_operand.vmem [shape: f32[2,1,32], index: 2, kind: input, shape index: {}]   ;;  %s3072_s3 = inlined_call_operand.vmem [shape: f32[2,1,32], index: 3, kind: input, shape index: {}]   ;;  %s3073_s4 = inlined_call_operand.vmem [shape: bf16[2,12,32,8], index: 4, kind: input, shape index: {}]   ;;  %s3074_s5 = inlined_call_operand.vmem [shape: f32[2,12,1,8], index: 5, kind: input, shape index: {}]   ;;  %s3075_s6 = inlined_call_operand.vmem [shape: bf16[2,4,8,32], index: 6, kind: input, shape index: {}]   ;;  %s3076_s7 = inlined_call_operand.vmem [shape: f32[2,1,32], index: 7, kind: input, shape index: {}]   ;;  %s3077_s8 = inlined_call_operand.vmem [shape: f32[2,1,32], index: 8, kind: input, shape index: {}]   ;;  %s3078_s9 = inlined_call_operand.vmem [shape: f32[2,1,32], index: 9, kind: input, shape index: {}]   ;;  %s3079_s10 = inlined_call_operand.vmem [shape: bf16[2,32,64], index: 10, kind: input, shape index: {}]   ;;  %s3080_s11 = inlined_call_operand.vmem [shape: f32[2,1,64], index: 11, kind: input, shape index: {}]   ;;  %s3081_s12 = inlined_call_operand.vmem [shape: bf16[2,64,32], index: 12, kind: input, shape index: {}]   ;;  %s3082_s13 = inlined_call_operand.vmem [shape: f32[2,1,32], index: 13, kind: input, shape index: {}]   ;;  %s3083_s14 = inlined_call_operand.vmem [shape: f32[1,32], index: 14, kind: input, shape index: {}]   ;;  %s3084_s15 = inlined_call_operand.vmem [shape: f32[1,32], index: 15, kind: input, shape index: {}]   ;;  %s3085_s16 = inlined_call_operand.vmem [shape: bf16[32,128], index: 16, kind: input, shape index: {}]   ;;  %s3086_s17 = inlined_call_operand.hbm [shape: f32[2,8,128], index: 17, kind: output, shape index: {0}]   ;;  %s3087_s18 = inlined_call_operand.vmem [shape: f32[2,1,128], index: 18, kind: output, shape index: {1}]  }
   0x1   :  { %3105 = sst [smem:[#allocation20_spill]] %s3069_s0 }
   0x2   :  { %3106 = sst [smem:[#allocation21_spill]] %s3070_s1 }
   0x3   :  { %3107 = sst [smem:[#allocation22_spill]] %s3071_s2 }
   0x4   :  { %3108 = sst [smem:[#allocation23_spill]] %s3073_s4 }
   0x5   :  { %3109 = sst [smem:[#allocation24_spill]] %s3074_s5 }
   0x6   :  { %3110 = sst [smem:[#allocation25_spill]] %s3075_s6 }
   0x7   :  { %3111 = sst [smem:[#allocation26_spill]] %s3081_s12 }
   0x8   :  { %3112 = sst [smem:[#allocation27_spill]] %s3082_s13 }
   0x9   :  { %3113 = sst [smem:[#allocation28_spill]] %s3083_s14 }
   0xa   :  { %3114 = sst [smem:[#allocation29_spill]] %s3084_s15 }
   0xb   :  { %3115 = sst [smem:[#allocation30_spill]] %s3085_s16 }
   0xc   :  { %3116 = sst [smem:[#allocation31_spill]] %s3086_s17 }
   0xd   :  { %3117 = sst [smem:[#allocation32_spill]] %s3087_s18 }
   0xe   :  { %24 = vsyncpa [#allocation4], 0 }
   0xf   :  { %26 = vsyncpa [#allocation4 + $0x1], 0  ;;  %s2674_s27 = smov 0   ;;  %s2676_s28 = smov 0  }
  0x10   :  { %s2678_s29 = smov 0   ;;  %s2680_s30 = smov 0  }
  0x11   :  { %s2682_s0 = smov 0   ;;  %s2684_s19 = smov 0  }
  0x12   :  { %s2686_s1 = smov 0   ;;  %s2688_s20 = smov 0  }
  0x13 LB: > { %3118 = sst [smem:[#allocation6_spill]] %s2546_s27  ;;  %s2135_s21 = sadd.s32 4294967295, %s2574_s20   ;;  %s2574_s20 = sphi %s2688_s20, %s32_s20   ;;  %s2570_s1 = sphi %s2686_s1, %s3172_s1   ;;  %s2566_s19 = sphi %s2684_s19, %s3171_s19   ;;  %s2562_s0 = sphi %s2682_s0, %s3170_s0   ;;  %s2558_s30 = sphi %s2680_s30, %s3169_s30   ;;  %s2554_s29 = sphi %s2678_s29, %s3168_s29   ;;  %s2550_s28 = sphi %s2676_s28, %s3167_s28   ;;  %s2546_s27 = sphi %s2674_s27, %s3166_s27  }
  0x14   : > { %3119 = sst [smem:[#allocation7_spill]] %s2550_s28  ;;  %s2136_s22 = sadd.s32 4294967294, %s2574_s20  }
  0x15   : > { %3120 = sst [smem:[#allocation8_spill]] %s2554_s29  ;;  %s41_s2 = sadd.s32 1, %s2566_s19 }
  0x16   : > { %3121 = sst [smem:[#allocation9_spill]] %s2558_s30  ;;  %p42_p0 = scmp.ge.s32.totalorder %s41_s2, 2 }
  0x17   : > { %3122 = sst [smem:[#allocation10_spill]] %s2562_s0  ;;  %s44_s23 = sadd.s32 1, %s2570_s1 }
  0x18   : > { %3123 = sst [smem:[#allocation11_spill]] %s2566_s19  ;;  %p488_p1 = scmp.ne.s32.totalorder %s2554_s29, %s2550_s28 }
  0x19   : > { %3124 = sst [smem:[#allocation12_spill]] %s2570_s1  ;;  %p489_p2 = scmp.eq.s32.totalorder %s2135_s21, 3 }
  0x1a   : > { %3125 = sst [smem:[#allocation13_spill]] %s2574_s20  ;;  %s3174_s2 = smov (%p42_p0, %s41_s2), 0 }
  0x1b   : > { %3126 = sst [smem:[#allocation14_spill]] %s3174_s2  ;;  %s3176_s23 = smov (!%p42_p0, %s44_s23), %s2570_s1 }
  0x1c   : > { %p2723_p3 = por %p489_p2, %p488_p1  ;;  %p494_p4 = scmp.ne.s32.totalorder %s2550_s28, %s2546_s27 }
  0x1d   : > { %p46_p5 = scmp.ge.s32.totalorder %s3176_s23, 2  ;;  %p495_p6 = scmp.eq.s32.totalorder %s2136_s22, 3 }
  0x1e   : > { %s3127_s24 = scalar_select %p2723_p3, 1, 0 }
  0x1f   : > { %p2139_p7 = scmp.ge.s32.totalorder %s2574_s20, 1  ;;  %p643_p8 = scmp.lt.s32.totalorder %s2574_s20, 5 }
  0x20   : > { %3128 = sst [smem:[#allocation15_spill]] %s3127_s24  ;;  %s3178_s23 = smov (%p46_p5, %s3176_s23), 0 }
  0x21   : > { %3129 = sst [smem:[#allocation16_spill]] %s3178_s23  ;;  %p2733_p9 = por %p495_p6, %p494_p4 }
  0x22   : > { %p644_p10 = pnand %p2139_p7, %p643_p8  ;;  %s475_s26 = ssub.s32 %s2570_s1, %s3178_s23 }
  0x23   : > { %s3130_s25 = scalar_select %p2733_p9, 1, 0 }
  0x24   : > { %s478_s21 = sadd.s32 1, %s2554_s29  ;;  %p476_p11 = scmp.eq.s32.totalorder %s475_s26, 0 }
  0x25   : > { %3131 = sst [smem:[#allocation17_spill]] %s3130_s25  ;;  %647 = sbr.rel (%p644_p10) target bundleno = 2607 (0xa2f), region = 88 }
  0x26   : > { %s2741_s2 = scalar_select %p476_p11, %s2554_s29, %s478_s21  }
  0x28   : > { %3132 = sst [smem:[#allocation18_spill]] %s2741_s2 }
  0x2a   : > { %s3092_s22 = sand.u32 1, %s2550_s28   ;;  %p748_p12 = scmp.lt.s32.totalorder %s2562_s0, 1 }
  0x2b   : > { %s2747_s19 = sshll.u32 %s3092_s22, 3  ;;  %p756_p13 = scmp.lt.s32.totalorder %s2558_s30, 1 }
  0x2c   : > { %s2751_s25 = scalar_select %p748_p12, %s2562_s0, 1 }
  0x2d   : > { %s2754_s26 = scalar_select %p756_p13, %s2558_s30, 1 }
  0x2e   : > { %3133 = sst [smem:[#allocation19_spill]] %s2751_s25  ;;  %s2141_s21 = sshll.u32 %s2751_s25, 3 }
  0x2f   : > { %s3135_s27 = sld [smem:[#allocation20_spill]]  ;;  %s2347_s23 = smul.u32 192, %s2754_s26 }
  0x30   : > { %s3136_s28 = sld [smem:[#allocation21_spill]]  ;;  %s2312_s22 = sshll.u32 %s2754_s26, 4 }
  0x31   : > { %s2348_s29 = smul.u32 12, %s2754_s26  ;;  %s3138_s6 = sld [smem:[#allocation25_spill]] }
  0x32   : > { %s3139_s4 = sld [smem:[#allocation23_spill]]  ;;  %s792_s16 = scalar_lea.vmem %s3080_s11, %s2754_s26 }
  0x33   : > { %s3140_s5 = sld [smem:[#allocation24_spill]]  ;;  %s2314_s12 = sshll.u32 %s2754_s26, 5 }
  0x34   : > { %s3142_s2 = sld [smem:[#allocation27_spill]] }
  0x35   : > { %s751_s20 = scalar_lea.vmem %s3135_s27, %s2141_s21  ;;  %s742_s27 = scalar_lea.vmem [#allocation3], %s2747_s19 }
  0x36   : > { %s2767_s0 = scalar_lea.vmem %s3136_s28, %s2141_s21  ;;  %s2810_s28 = scalar_lea.vmem %s3079_s10, %s2312_s22 }
  0x37   : > { %s2783_s18 = scalar_lea.vmem %s3138_s6, %s2312_s22  ;;  %s3143_s25 = sld [smem:[#allocation9_spill]] }
  0x38   : > { %s2788_s24 = scalar_lea.vmem %s3139_s4, %s2347_s23  ;;  %s3141_s4 = sld [smem:[#allocation26_spill]] }
  0x39   : > { %s2797_s21 = scalar_lea.vmem %s3140_s5, %s2348_s29 }
  0x3a   : > { %s800_s6 = scalar_lea.vmem %s3142_s2, %s2754_s26 }
  0x3d   : > { %p2150_p0 = scmp.ne.s32.totalorder %s3143_s25, 0 }
  0x3e   : > { %s2820_s5 = scalar_lea.vmem %s3141_s4, %s2314_s12 }
  0x3f   : > { %808 = sbr.rel (%p2150_p0) target bundleno = 70 (0x46), region = 92 }
  0x44   : > { %v809_v0 = vld [vmem:[%s751_s20] sm:$0xff]  ;;  %vm810_vm0 = vcmask 261120  }
  0x45   : > { %811 = vst.msk [vmem:[#allocation2] sm:$0xff] %vm810_vm0, %v809_v0 }
  0x46 PF: > { %vm815_vm1 = vcmask 261120   ;;  %v2576_v3 = vmov 32.0   ;;  %v2316_v15 = vld [vmem:[%s2788_s24 + $0x8] sm:$0xff]  ;;  %v2318_v16 = vld [vmem:[%s2788_s24 + $0x18] sm:$0xff]  ;;  %v2315_v19 = vld [vmem:[%s2788_s24] sm:$0xff]  ;;  %s3144_s25 = sld [smem:[#allocation22_spill]]  ;;  %s3146_s23 = scalar_lea.vmem %s3072_s3, %s2754_s26 }
  0x47   : > { %2446 = vrcp.f32 %v2576_v3  ;;  %v2320_v17 = vld [vmem:[%s2788_s24 + $0x28] sm:$0xff]  ;;  %v2322_v18 = vld [vmem:[%s2788_s24 + $0x38] sm:$0xff]  ;;  %971 = vmatpush.bf16.msra.mxu0 %v2316_v15  ;;  %996 = vmatpush.bf16.msra.mxu1 %v2318_v16  ;;  %v2317_v20 = vld [vmem:[%s2788_s24 + $0x10] sm:$0xff]  ;;  %vm1270_vm6 = vcmask 64512   ;;  %vm1460_vm7 = vcmask 1043456   ;;  %s3148_s15 = scalar_lea.vmem %s3077_s8, %s2754_s26  ;;  %s3149_s13 = scalar_lea.vmem %s3078_s9, %s2754_s26 }
  0x48   : > { %1021 = vmatpush.bf16.msra.mxu2 %v2320_v17  ;;  %1046 = vmatpush.bf16.msra.mxu3 %v2322_v18  ;;  %v2319_v21 = vld [vmem:[%s2788_s24 + $0x20] sm:$0xff]  ;;  %v2321_v22 = vld [vmem:[%s2788_s24 + $0x30] sm:$0xff]  ;;  %v2324_v24 = vld [vmem:[%s2788_s24 + $0x48] sm:$0xff]  ;;  %s3151_s20 = sld [smem:[#allocation9_spill]] }
  0x49   : > { %v2326_v25 = vld [vmem:[%s2788_s24 + $0x58] sm:$0xff]  ;;  %v2328_v26 = vld [vmem:[%s2788_s24 + $0x68] sm:$0xff]  ;;  %v2323_v29 = vld [vmem:[%s2788_s24 + $0x40] sm:$0xff] }
  0x4a   : > { %v2330_v28 = vld [vmem:[%s2788_s24 + $0x78] sm:$0xff]  ;;  %v2325_v30 = vld [vmem:[%s2788_s24 + $0x50] sm:$0xff]  ;;  %v2327_v32 = vld [vmem:[%s2788_s24 + $0x60] sm:$0xff] }
  0x4b   : > { %972 = vmatpush.bf16.msra.mxu0 %v2315_v19  ;;  %997 = vmatpush.bf16.msra.mxu1 %v2317_v20  ;;  %v2329_v33 = vld [vmem:[%s2788_s24 + $0x70] sm:$0xff]  ;;  %v2428_v42 = vld [vmem:[%s3146_s23] ss:$0 sm:$0xff]  ;;  %v2332_v47 = vld [vmem:[%s2788_s24 + $0x88] sm:$0xff] }
  0x4c   : > { %v2828_v1 = vld [vmem:[#allocation2] sm:$0xff]  ;;  %1022 = vmatpush.bf16.msra.mxu2 %v2319_v21  ;;  %1047 = vmatpush.bf16.msra.mxu3 %v2321_v22  ;;  %s3145_s22 = scalar_lea.vmem %s3144_s25, %s2754_s26  ;;  %v2334_v48 = vld [vmem:[%s2788_s24 + $0x98] sm:$0xff]  ;;  %v2336_v49 = vld [vmem:[%s2788_s24 + $0xa8] sm:$0xff] }
  0x4d   : > { %v816_v2 = vsel %vm815_vm1, %v2828_v1, 0.0  ;;  %v2447_v4 = vpop.eup %2446  ;;  %v2427_v40 = vld [vmem:[%s3145_s22] ss:$0 sm:$0xff]  ;;  %v2338_v50 = vld [vmem:[%s2788_s24 + $0xb8] sm:$0xff]  ;;  %v2333_v52 = vld [vmem:[%s2788_s24 + $0x90] sm:$0xff] }
  0x4e   : > { %817 = vadd.xlane.f32.xlu0 %v816_v2  ;;  %v820_v5 = vmul.f32 32.0, %v2447_v4  ;;  %vm824_vm2 = vweird.f32 %v2447_v4  ;;  %v2331_v51 = vld [vmem:[%s2788_s24 + $0x80] sm:$0xff]  ;;  %v2337_v54 = vld [vmem:[%s2788_s24 + $0xb0] sm:$0xff]  ;;  %p2297_p1 = scmp.ne.s32.totalorder %s3151_s20, 1 }
  0x4f   : > { %1071 = vmatpush.bf16.msrb.mxu0 %v2324_v24  ;;  %1096 = vmatpush.bf16.msrb.mxu1 %v2326_v25  ;;  %v2335_v53 = vld [vmem:[%s2788_s24 + $0xa0] sm:$0xff]  ;;  %s3152_s25 = sld [smem:[#allocation30_spill]] (!%p2297_p1) }
  0x50   : > { %v821_v6 = vsub.f32 1.0, %v820_v5  ;;  %1121 = vmatpush.bf16.msrb.mxu2 %v2328_v26  ;;  %1146 = vmatpush.bf16.msrb.mxu3 %v2330_v28  ;;  %v2433_v61 = vld [vmem:[%s2797_s21 + $0x4] ss:$0 sm:$0xff]  ;;  %v2434_v62 = vld [vmem:[%s2797_s21 + $0x5] ss:$0 sm:$0xff]  ;;  %s3154_s14 = sld [smem:[#allocation29_spill]] (!%p2297_p1) }
  0x51   : > { %v2429_v2 = vld [vmem:[%s2797_s21] ss:$0 sm:$0xff]  ;;  %v2430_v3 = vld [vmem:[%s2797_s21 + $0x1] ss:$0 sm:$0xff]  ;;  %v2431_v17 = vld [vmem:[%s2797_s21 + $0x2] ss:$0 sm:$0xff] }
  0x52   : > { %v822_v7 = vmul.f32 %v2447_v4, %v821_v6  ;;  %v2432_v18 = vld [vmem:[%s2797_s21 + $0x3] ss:$0 sm:$0xff] }
  0x53   : > { %1072 = vmatpush.bf16.msrb.mxu0 %v2323_v29  ;;  %1097 = vmatpush.bf16.msrb.mxu1 %v2325_v30 }
  0x54   : > { %v823_v8 = vadd.f32 %v2447_v4, %v822_v7  ;;  %1122 = vmatpush.bf16.msrb.mxu2 %v2327_v32  ;;  %1147 = vmatpush.bf16.msrb.mxu3 %v2329_v33 }
  0x56   : > { %v2832_v9 = vsel %vm824_vm2, %v2447_v4, %v823_v8 }
  0xc1   : > { %v818_v10 = vpop.xlane.xlu0 %817 }
  0xc2   : > { %v826_v11 = vmul.f32 %v2832_v9, %v818_v10 }
  0xc4   : > { %v827_v12 = vsub.f32 %v2828_v1, %v826_v11 }
  0xc6   : > { %v828_v13 = vmul.f32 %v827_v12, %v827_v12 }
  0xc8   : > { %v829_v14 = vsel %vm815_vm1, %v828_v13, 0.0  ;;  %v2435_v13 = vld [vmem:[%s2797_s21 + $0x6] ss:$0 sm:$0xff] }
  0xc9   : > { %830 = vadd.xlane.f32.xlu0 %v829_v14  ;;  %v2436_v14 = vld [vmem:[%s2797_s21 + $0x7] ss:$0 sm:$0xff] }
 0x13c   : > { %v831_v23 = vpop.xlane.xlu0 %830 }
 0x13d   : > { %v832_v27 = vmul.f32 %v831_v23, %v2832_v9 }
 0x13f   : > { %v833_v31 = vadd.f32 1e-05, %v832_v27 }
 0x141   : > { %2448 = vrsqrt.f32 %v833_v31  ;;  %vm840_vm4 = vweird.f32 %v833_v31 }
 0x147   : > { %v2449_v34 = vpop.eup %2448 }
 0x148   : > { %v835_v35 = vmul.f32 %v2449_v34, %v833_v31  ;;  %vm841_vm3 = vweird.f32 %v2449_v34 }
 0x149   : > { %vm842_vm5 = vmor %vm840_vm4, %vm841_vm3 }
 0x14a   : > { %v836_v36 = vmul.f32 %v2449_v34, %v835_v35  ;;  %v2437_v35 = vld [vmem:[%s2797_s21 + $0x8] ss:$0 sm:$0xff] }
 0x14c   : > { %v837_v37 = vmul.f32 0.5, %v836_v36  ;;  %v2438_v36 = vld [vmem:[%s2797_s21 + $0x9] ss:$0 sm:$0xff] }
 0x14e   : > { %v838_v38 = vsub.f32 1.5, %v837_v37 }
 0x150   : > { %v839_v39 = vmul.f32 %v2449_v34, %v838_v38 }
 0x152   : > { %v843_v41 = vsel %vm842_vm5, %v2449_v34, %v839_v39 }
 0x153   : > { %v844_v43 = vmul.f32 %v843_v41, %v827_v12 }
 0x155   : > { %v848_v44 = vmul.f32 %v2427_v40, %v844_v43 }
 0x157   : > { %v852_v45 = vadd.f32 %v2428_v42, %v848_v44 }
 0x159   : > { %v853_v46 = vpack.c.bf16 %v852_v45, %v852_v45 }
 0x15b   : > { %2159 = vmatmul.msk.bf16.vlgmr.msra.gmra.mxu0 %vm815_vm1, %v853_v46  ;;  %2168 = vmatmul.msk.bf16.vlgmr.msra.gmra.mxu1 %vm815_vm1, %v853_v46 }
 0x15c   : > { %2177 = vmatmul.msk.bf16.vlgmr.msra.gmra.mxu2 %vm815_vm1, %v853_v46  ;;  %2186 = vmatmul.msk.bf16.vlgmr.msra.gmra.mxu3 %vm815_vm1, %v853_v46 }
 0x15d   : > { %1171 = vmatpush.bf16.msra.mxu0 %v2332_v47  ;;  %1196 = vmatpush.bf16.msra.mxu1 %v2334_v48 }
 0x15e   : > { %1221 = vmatpush.bf16.msra.mxu2 %v2336_v49  ;;  %1246 = vmatpush.bf16.msra.mxu3 %v2338_v50  ;;  %v2439_v49 = vld [vmem:[%s2797_s21 + $0xa] ss:$0 sm:$0xff]  ;;  %v2440_v50 = vld [vmem:[%s2797_s21 + $0xb] ss:$0 sm:$0xff]  ;;  %s3147_s21 = scalar_lea.vmem %s3076_s7, %s2754_s26 }
 0x161   : > { %1172 = vmatpush.bf16.msra.mxu0 %v2331_v51  ;;  %1197 = vmatpush.bf16.msra.mxu1 %v2333_v52 }
 0x162   : > { %1222 = vmatpush.bf16.msra.mxu2 %v2335_v53  ;;  %1247 = vmatpush.bf16.msra.mxu3 %v2337_v54 }
 0x16b   : > { %2195 = vmatmul.msk.bf16.vlgmr.msrb.gmra.mxu0 %vm815_vm1, %v853_v46  ;;  %2204 = vmatmul.msk.bf16.vlgmr.msrb.gmra.mxu1 %vm815_vm1, %v853_v46 }
 0x16c   : > { %2213 = vmatmul.msk.bf16.vlgmr.msrb.gmra.mxu2 %vm815_vm1, %v853_v46  ;;  %2222 = vmatmul.msk.bf16.vlgmr.msrb.gmra.mxu3 %vm815_vm1, %v853_v46 }
 0x17b   : > { %2231 = vmatmul.msk.bf16.vlgmr.msra.gmra.mxu0 %vm815_vm1, %v853_v46  ;;  %2240 = vmatmul.msk.bf16.vlgmr.msra.gmra.mxu1 %vm815_vm1, %v853_v46 }
 0x17c   : > { %2249 = vmatmul.msk.bf16.vlgmr.msra.gmra.mxu2 %vm815_vm1, %v853_v46  ;;  %2258 = vmatmul.msk.bf16.vlgmr.msra.gmra.mxu3 %vm815_vm1, %v853_v46 }
 0x1d8   : > { %v974_v55 = vpop.f32.mrf.mxu0  ;;  %v999_v56 = vpop.f32.mrf.mxu1 }
 0x1d9   : > { %v975_v11 = vadd.f32 %v2429_v2, %v974_v55  ;;  %v1000_v12 = vadd.f32 %v2430_v3, %v999_v56  ;;  %v1257_v2 = vlaneseq }
 0x1db   : > { %v1253_v21 = vmul.f32 0.35355338, %v975_v11  ;;  %v1254_v22 = vmul.f32 0.35355338, %v1000_v12  ;;  %v1258_v3 = vshrl.u32 %v1257_v2, 7 }
 0x1dd   : > { %v1262_v31 = vpack.c.bf16 %v1253_v21, %v1253_v21  ;;  %v1263_v32 = vpack.c.bf16 %v1254_v22, %v1254_v22 }
 0x1df   : > { %v1024_v57 = vpop.f32.mrf.mxu2  ;;  %v1049_v58 = vpop.f32.mrf.mxu3 }
 0x1e0   : > { %v976_v59 = vpop.f32.mrf.mxu0  ;;  %v1001_v60 = vpop.f32.mrf.mxu1  ;;  %v1025_v27 = vadd.f32 %v2431_v17, %v1024_v57  ;;  %v1050_v28 = vadd.f32 %v2432_v18, %v1049_v58 }
 0x1e2   : > { %v1255_v37 = vmul.f32 0.35355338, %v1025_v27  ;;  %v1256_v38 = vmul.f32 0.35355338, %v1050_v28 }
 0x1e4   : > { %v1264_v45 = vpack.c.bf16 %v1255_v37, %v1255_v37  ;;  %v1265_v46 = vpack.c.bf16 %v1256_v38, %v1256_v38 }
 0x1e7   : > { %v1026_v63 = vpop.f32.mrf.mxu2  ;;  %v1051_v0 = vpop.f32.mrf.mxu3 }
 0x1e8   : > { %v1074_v4 = vpop.f32.mrf.mxu0  ;;  %v1099_v5 = vpop.f32.mrf.mxu1 }
 0x1e9   : > { %v1075_v6 = vadd.f32 %v2433_v61, %v1074_v4  ;;  %v1100_v7 = vadd.f32 %v2434_v62, %v1099_v5  ;;  %v2908_v4 = vand.u32 127, %v1257_v2 }
 0x1eb   : > { %v1266_v8 = vpack.c.bf16 %v1075_v6, %v1075_v6  ;;  %v1267_v10 = vpack.c.bf16 %v1100_v7, %v1100_v7  ;;  %vm1261_vm8 = vcmp.le.s32.totalorder %v2908_v4, %v1258_v3 }
 0x1ed   : > { %v1275_v15 = vsel %vm1270_vm6, %v1266_v8, 0  ;;  %v1294_v16 = vsel %vm1270_vm6, %v1267_v10, 0 }
 0x1ee   : > { %1284 = vmatpush.bf16.xpose.msrb.mxu0 %v1275_v15  ;;  %1303 = vmatpush.bf16.xpose.msrb.mxu1 %v1294_v16 }
 0x1ef   : > { %v1124_v19 = vpop.f32.mrf.mxu2  ;;  %v1149_v20 = vpop.f32.mrf.mxu3 }
 0x1f0   : > { %v1125_v23 = vadd.f32 %v2435_v13, %v1124_v19  ;;  %v1150_v24 = vadd.f32 %v2436_v14, %v1149_v20  ;;  %v1076_v25 = vpop.f32.mrf.mxu0  ;;  %v1101_v26 = vpop.f32.mrf.mxu1 }
 0x1f2   : > { %v1268_v29 = vpack.c.bf16 %v1125_v23, %v1125_v23  ;;  %v1269_v30 = vpack.c.bf16 %v1150_v24, %v1150_v24 }
 0x1f4   : > { %v1313_v33 = vsel %vm1270_vm6, %v1268_v29, 0  ;;  %v1332_v34 = vsel %vm1270_vm6, %v1269_v30, 0 }
 0x1f5   : > { %1322 = vmatpush.bf16.xpose.msrb.mxu2 %v1313_v33  ;;  %1341 = vmatpush.bf16.xpose.msrb.mxu3 %v1332_v34 }
 0x1f6   : > { %2259 = vmatmul.msk.bf16.vlgmr.msrb.gmra.mxu0 %vm1270_vm6, %v1262_v31  ;;  %2260 = vmatmul.msk.bf16.vlgmr.msrb.gmra.mxu1 %vm1270_vm6, %v1263_v32 }
 0x1f7   : > { %v1126_v39 = vpop.f32.mrf.mxu2  ;;  %v1151_v40 = vpop.f32.mrf.mxu3 }
 0x1f8   : > { %v1174_v41 = vpop.f32.mrf.mxu0  ;;  %v1199_v42 = vpop.f32.mrf.mxu1 }
 0x1f9   : > { %v1175_v43 = vadd.f32 %v2437_v35, %v1174_v41  ;;  %v1200_v44 = vadd.f32 %v2438_v36, %v1199_v42 }
 0x1fb   : > { %v1453_v47 = vpack.c.bf16 %v1175_v43, %v1175_v43  ;;  %v1454_v48 = vpack.c.bf16 %v1200_v44, %v1200_v44 }
 0x1fc   : > { %2261 = vmatmul.msk.bf16.vlgmr.msrb.gmra.mxu2 %vm1270_vm6, %v1264_v45  ;;  %2262 = vmatmul.msk.bf16.vlgmr.msrb.gmra.mxu3 %vm1270_vm6, %v1265_v46 }
 0x1fd   : > { %v1462_v51 = vsel %vm1460_vm7, %v1453_v47, 0  ;;  %v1481_v52 = vsel %vm1460_vm7, %v1454_v48, 0 }
 0x1fe   : > { %1471 = vmatpush.bf16.msra.mxu0 %v1462_v51  ;;  %1490 = vmatpush.bf16.msra.mxu1 %v1481_v52 }
 0x1ff   : > { %v1224_v53 = vpop.f32.mrf.mxu2  ;;  %v1249_v54 = vpop.f32.mrf.mxu3 }
 0x200   : > { %v1225_v55 = vadd.f32 %v2439_v49, %v1224_v53  ;;  %v1250_v56 = vadd.f32 %v2440_v50, %v1249_v54  ;;  %v1176_v57 = vpop.f32.mrf.mxu0  ;;  %v1201_v58 = vpop.f32.mrf.mxu1 }
 0x202   : > { %v1455_v59 = vpack.c.bf16 %v1225_v55, %v1225_v55  ;;  %v1456_v60 = vpack.c.bf16 %v1250_v56, %v1250_v56 }
 0x204   : > { %v1500_v61 = vsel %vm1460_vm7, %v1455_v59, 0  ;;  %v1519_v62 = vsel %vm1460_vm7, %v1456_v60, 0 }
 0x205   : > { %1509 = vmatpush.bf16.msra.mxu2 %v1500_v61  ;;  %1528 = vmatpush.bf16.msra.mxu3 %v1519_v62 }
 0x207   : > { %v1226_v63 = vpop.f32.mrf.mxu2  ;;  %v1251_v0 = vpop.f32.mrf.mxu3 }
 0x273   : > { %v1286_v5 = vpop.f32.mrf.mxu0  ;;  %v1305_v6 = vpop.f32.mrf.mxu1 }
 0x274   : > { %v1349_v7 = vsel %vm1261_vm8, %v1286_v5, -1e+30  ;;  %v1350_v10 = vsel %vm1261_vm8, %v1305_v6, -1e+30 }
 0x275   : > { %v1353_v8 = vsel %vm1270_vm6, %v1349_v7, -inf  ;;  %v1356_v13 = vsel %vm1270_vm6, %v1350_v10, -inf }
 0x276   : > { %1354 = vmax.xlane.f32.xlu2 %v1353_v8 }
 0x27b   : > { %v1288_v11 = vpop.f32.mrf.mxu0  ;;  %v1307_v12 = vpop.f32.mrf.mxu1 }
 0x27e   : > { %1357 = vmax.xlane.f32.xlu2 %v1356_v13 }
 0x27f   : > { %v1324_v14 = vpop.f32.mrf.mxu2  ;;  %v1343_v15 = vpop.f32.mrf.mxu3 }
 0x280   : > { %v1351_v16 = vsel %vm1261_vm8, %v1324_v14, -1e+30  ;;  %v1352_v18 = vsel %vm1261_vm8, %v1343_v15, -1e+30 }
 0x281   : > { %v1359_v17 = vsel %vm1270_vm6, %v1351_v16, -inf  ;;  %v1362_v21 = vsel %vm1270_vm6, %v1352_v18, -inf }
 0x282   : > { %1360 = vmax.xlane.f32.xlu1 %v1359_v17 }
 0x287   : > { %v1326_v19 = vpop.f32.mrf.mxu2  ;;  %v1345_v20 = vpop.f32.mrf.mxu3 }
 0x28a   : > { %1363 = vmax.xlane.f32.xlu1 %v1362_v21 }
 0x2e9   : > { %v1355_v22 = vpop.xlane.xlu2 %1354 }
 0x2ea   : > { %v1365_v23 = vsub.f32 %v1349_v7, %v1355_v22 }
 0x2ec   : > { %v1369_v24 = vmul.f32 1.442695, %v1365_v23 }
 0x2ee   : > { %2450 = vpow2.f32 %v1369_v24 }
 0x2f1   : > { %v1358_v26 = vpop.xlane.xlu2 %1357 }
 0x2f2   : > { %v1366_v30 = vsub.f32 %v1350_v10, %v1358_v26 }
 0x2f4   : > { %v2451_v25 = vpop.eup %2450  ;;  %v1371_v32 = vmul.f32 1.442695, %v1366_v30 }
 0x2f5   : > { %v1361_v27 = vpop.xlane.xlu1 %1360  ;;  %v1377_v28 = vsel %vm1270_vm6, %v2451_v25, 0.0 }
 0x2f6   : > { %v1367_v29 = vsub.f32 %v1351_v16, %v1361_v27  ;;  %1378 = vadd.xlane.f32.xlu2 %v1377_v28 }
 0x2f8   : > { %v1373_v31 = vmul.f32 1.442695, %v1367_v29 }
 0x2fa   : > { %2452 = vpow2.f32 %v1373_v31 }
 0x2fb   : > { %2454 = vpow2.f32 %v1371_v32 }
 0x2fd   : > { %v1364_v33 = vpop.xlane.xlu1 %1363 }
 0x2fe   : > { %v1368_v34 = vsub.f32 %v1352_v18, %v1364_v33  ;;  %v1538_v33 = vld [vmem:[%s2783_s18] sm:$0xf] }
 0x300   : > { %v2453_v35 = vpop.eup %2452  ;;  %v1375_v36 = vmul.f32 1.442695, %v1368_v34  ;;  %v1546_v34 = vsel %vm1460_vm7, %v1538_v33, 0  ;;  %v2344_v33 = vld [vmem:[%s2820_s5 + $0x18] sm:$0xff] }
 0x301   : > { %v1383_v37 = vsel %vm1270_vm6, %v2453_v35, 0.0  ;;  %v2925_v38 = vpop.eup %2454  ;;  %1555 = vmatpush.bf16.msrb.mxu0 %v1546_v34  ;;  %v2343_v34 = vld [vmem:[%s2820_s5 + $0x10] sm:$0xff] }
 0x302   : > { %2456 = vpow2.f32 %v1375_v36  ;;  %1384 = vadd.xlane.f32.xlu0 %v1383_v37  ;;  %v1380_v41 = vsel %vm1270_vm6, %v2925_v38, 0.0  ;;  %v1539_v37 = vld [vmem:[%s2783_s18 + $0x4] sm:$0xf] }
 0x308   : > { %v2927_v39 = vpop.eup %2456 }
 0x309   : > { %v1386_v40 = vsel %vm1270_vm6, %v2927_v39, 0.0 }
 0x30a   : > { %1387 = vadd.xlane.f32.xlu1 %v1386_v40  ;;  %1381 = vadd.xlane.f32.xlu0 %v1380_v41  ;;  %v1541_v40 = vld [vmem:[%s2783_s18 + $0xc] sm:$0xf] }
 0x369   : > { %v1379_v42 = vpop.xlane.xlu2 %1378 }
 0x36a   : > { %2458 = vrcp.f32 %v1379_v42  ;;  %v1400_v46 = vand.u32 2147483648, %v1379_v42  ;;  %v1398_v48 = vand.u32 2147483647, %v1379_v42  ;;  %vm1394_vm10 = vweird.f32 %v1379_v42 }
 0x36c   : > { %v1401_v51 = vor.u32 1.1754944e-38, %v1400_v46  ;;  %vm1399_vm12 = vcmp.eq.f32.partialorder %v1398_v48, 8.507059e+37 }
 0x370   : > { %v2459_v43 = vpop.eup %2458 }
 0x371   : > { %v1390_v44 = vmul.f32 %v2459_v43, %v1379_v42  ;;  %vm1395_vm9 = vweird.f32 %v2459_v43 }
 0x372   : > { %vm1396_vm11 = vmor %vm1394_vm10, %vm1395_vm9 }
 0x373   : > { %v1391_v45 = vsub.f32 1.0, %v1390_v44 }
 0x375   : > { %v1392_v47 = vmul.f32 %v2459_v43, %v1391_v45  ;;  %v1385_v49 = vpop.xlane.xlu0 %1384 }
 0x376   : > { %2460 = vrcp.f32 %v1385_v49  ;;  %v1428_v61 = vand.u32 2147483648, %v1385_v49  ;;  %v1426_v63 = vand.u32 2147483647, %v1385_v49  ;;  %vm1422_vm14 = vweird.f32 %v1385_v49 }
 0x377   : > { %v1393_v50 = vadd.f32 %v2459_v43, %v1392_v47 }
 0x378   : > { %v1429_v3 = vor.u32 1.1754944e-38, %v1428_v61  ;;  %vm1427_vm0 = vcmp.eq.f32.partialorder %v1426_v63, 8.507059e+37 }
 0x379   : > { %v1397_v52 = vsel %vm1396_vm11, %v2459_v43, %v1393_v50 }
 0x37a   : > { %v1402_v53 = vsel %vm1399_vm12, %v1401_v51, %v1397_v52 }
 0x37b   : > { %v1445_v54 = vmul.f32 %v2451_v25, %v1402_v53 }
 0x37c   : > { %v2461_v55 = vpop.eup %2460 }
 0x37d   : > { %v1418_v56 = vmul.f32 %v2461_v55, %v1385_v49  ;;  %v1388_v57 = vpop.xlane.xlu1 %1387  ;;  %v1382_v58 = vpop.xlane.xlu0 %1381  ;;  %v1449_v59 = vpack.c.bf16 %v1445_v54, %v1445_v54  ;;  %vm1423_vm13 = vweird.f32 %v2461_v55 }
 0x37e   : > { %2462 = vrcp.f32 %v1388_v57  ;;  %vm1424_vm15 = vmor %vm1422_vm14, %vm1423_vm13  ;;  %v1440_v13 = vand.u32 2147483647, %v1388_v57  ;;  %v1442_v14 = vand.u32 2147483648, %v1388_v57  ;;  %v1414_v17 = vand.u32 2147483648, %v1382_v58 }
 0x37f   : > { %v1419_v60 = vsub.f32 1.0, %v1418_v56  ;;  %2464 = vrcp.f32 %v1382_v58  ;;  %2263 = vmatmul.msk.bf16.vlgmr.msra.gmra.mxu0 %vm1270_vm6, %v1449_v59  ;;  %v1412_v20 = vand.u32 2147483647, %v1382_v58  ;;  %vm1436_vm4 = vweird.f32 %v1388_v57 }
 0x380   : > { %v1443_v22 = vor.u32 1.1754944e-38, %v1442_v14  ;;  %vm1408_vm8 = vweird.f32 %v1382_v58  ;;  %vm1441_vm9 = vcmp.eq.f32.partialorder %v1440_v13, 8.507059e+37  ;;  %v1415_v25 = vor.u32 1.1754944e-38, %v1414_v17  ;;  %v2339_v17 = vld [vmem:[%s2810_s28] sm:$0xff] }
 0x381   : > { %v1420_v62 = vmul.f32 %v2461_v55, %v1419_v60  ;;  %vm1413_vm11 = vcmp.eq.f32.partialorder %v1412_v20, 8.507059e+37  ;;  %vm1742_vm13 = vcmask 523264  }
 0x383   : > { %v1421_v0 = vadd.f32 %v2461_v55, %v1420_v62 }
 0x384   : > { %v2463_v2 = vpop.eup %2462 }
 0x385   : > { %v2465_v5 = vpop.eup %2464  ;;  %v1425_v6 = vsel %vm1424_vm15, %v2461_v55, %v1421_v0  ;;  %v1432_v7 = vmul.f32 %v2463_v2, %v1388_v57  ;;  %vm1437_vm2 = vweird.f32 %v2463_v2 }
 0x386   : > { %v1430_v8 = vsel %vm1427_vm0, %v1429_v3, %v1425_v6  ;;  %v1404_v10 = vmul.f32 %v2465_v5, %v1382_v58  ;;  %vm1409_vm3 = vweird.f32 %v2465_v5  ;;  %vm1438_vm5 = vmor %vm1436_vm4, %vm1437_vm2 }
 0x387   : > { %v1447_v11 = vmul.f32 %v2453_v35, %v1430_v8  ;;  %v1433_v12 = vsub.f32 1.0, %v1432_v7  ;;  %vm1410_vm10 = vmor %vm1408_vm8, %vm1409_vm3  ;;  %v1540_v35 = vld [vmem:[%s2783_s18 + $0x8] sm:$0xf]  ;;  %s3153_s18 = sld [smem:[#allocation28_spill]] (!%p2297_p1) }
 0x388   : > { %v1405_v15 = vsub.f32 1.0, %v1404_v10  ;;  %v1584_v36 = vsel %vm1460_vm7, %v1540_v35, 0  ;;  %v2342_v35 = vld [vmem:[%s2820_s5 + $0x8] sm:$0xff] }
 0x389   : > { %v1434_v16 = vmul.f32 %v2463_v2, %v1433_v12  ;;  %v1451_v18 = vpack.c.bf16 %v1447_v11, %v1447_v11  ;;  %1593 = vmatpush.bf16.msrb.mxu2 %v1584_v36  ;;  %v2341_v36 = vld [vmem:[%s2820_s5] sm:$0xff] }
 0x38a   : > { %v1406_v19 = vmul.f32 %v2465_v5, %v1405_v15 }
 0x38b   : > { %v1435_v21 = vadd.f32 %v2463_v2, %v1434_v16  ;;  %2265 = vmatmul.msk.bf16.vlgmr.msra.gmra.mxu2 %vm1270_vm6, %v1451_v18  ;;  %v2340_v16 = vld [vmem:[%s2810_s28 + $0x8] sm:$0xff] }
 0x38c   : > { %v1407_v23 = vadd.f32 %v2465_v5, %v1406_v19  ;;  %1693 = vmatpush.bf16.msra.mxu0 %v2340_v16 }
 0x38d   : > { %v1439_v24 = vsel %vm1438_vm5, %v2463_v2, %v1435_v21 }
 0x38e   : > { %v1444_v26 = vsel %vm1441_vm9, %v1443_v22, %v1439_v24  ;;  %v1411_v27 = vsel %vm1410_vm10, %v2465_v5, %v1407_v23  ;;  %v2441_v5 = vld [vmem:[%s3147_s21] ss:$0 sm:$0xff] }
 0x38f   : > { %v1448_v28 = vmul.f32 %v2927_v39, %v1444_v26  ;;  %v1416_v29 = vsel %vm1413_vm11, %v1415_v25, %v1411_v27  ;;  %v1565_v39 = vsel %vm1460_vm7, %v1539_v37, 0  ;;  %v2442_v26 = vld [vmem:[%s3148_s15] ss:$0 sm:$0xff] }
 0x390   : > { %v1446_v30 = vmul.f32 %v2925_v38, %v1416_v29  ;;  %1574 = vmatpush.bf16.msrb.mxu1 %v1565_v39  ;;  %v1603_v38 = vsel %vm1460_vm7, %v1541_v40, 0  ;;  %1694 = vmatpush.bf16.msra.mxu0 %v2339_v17  ;;  %v2443_v29 = vld [vmem:[%s3149_s13] ss:$0 sm:$0xff]  ;;  %s3156_s13 = sld [smem:[#allocation32_spill]] (!%p2297_p1) }
 0x391   : > { %v1452_v31 = vpack.c.bf16 %v1448_v28, %v1448_v28  ;;  %1612 = vmatpush.bf16.msrb.mxu3 %v1603_v38  ;;  %v2444_v37 = vld [vmem:[%s792_s16] ss:$0 sm:$0xff] }
 0x392   : > { %v1450_v32 = vpack.c.bf16 %v1446_v30, %v1446_v30 }
 0x393   : > { %2266 = vmatmul.msk.bf16.vlgmr.msra.gmra.mxu3 %vm1270_vm6, %v1452_v31 }
 0x394   : > { %2264 = vmatmul.msk.bf16.vlgmr.msra.gmra.mxu1 %vm1270_vm6, %v1450_v32 }
 0x395   : > { %1750 = vmatpush.bf16.msra.mxu1 %v2344_v33 }
 0x399   : > { %1751 = vmatpush.bf16.msra.mxu1 %v2343_v34 }
 0x39d   : > { %1752 = vmatpush.bf16.msra.mxu1 %v2342_v35 }
 0x3a1   : > { %1753 = vmatpush.bf16.msra.mxu1 %v2341_v36 }
 0x3fc   : > { %v1473_v41 = vpop.f32.mrf.mxu0 }
 0x3fd   : > { %v1534_v42 = vpack.c.bf16 %v1473_v41, %v1473_v41 }
 0x3ff   : > { %2267 = vmatmul.msk.bf16.vlgmr.msrb.gmra.mxu0 %vm1270_vm6, %v1534_v42 }
 0x404   : > { %v1475_v43 = vpop.f32.mrf.mxu0 }
 0x40e   : > { %v1511_v44 = vpop.f32.mrf.mxu2 }
 0x40f   : > { %v1536_v45 = vpack.c.bf16 %v1511_v44, %v1511_v44 }
 0x411   : > { %v1492_v46 = vpop.f32.mrf.mxu1  ;;  %2269 = vmatmul.msk.bf16.vlgmr.msrb.gmra.mxu2 %vm1270_vm6, %v1536_v45 }
 0x412   : > { %v1535_v47 = vpack.c.bf16 %v1492_v46, %v1492_v46 }
 0x414   : > { %2268 = vmatmul.msk.bf16.vlgmr.msrb.gmra.mxu1 %vm1270_vm6, %v1535_v47 }
 0x416   : > { %v1513_v48 = vpop.f32.mrf.mxu2  ;;  %v1530_v49 = vpop.f32.mrf.mxu3 }
 0x417   : > { %v1537_v50 = vpack.c.bf16 %v1530_v49, %v1530_v49 }
 0x419   : > { %v1494_v51 = vpop.f32.mrf.mxu1  ;;  %2270 = vmatmul.msk.bf16.vlgmr.msrb.gmra.mxu3 %vm1270_vm6, %v1537_v50 }
 0x41a   : > { %v2445_v51 = vld [vmem:[%s800_s6] ss:$0 sm:$0xff] }
 0x41e   : > { %v1532_v52 = vpop.f32.mrf.mxu3 }
 0x47c   : > { %v1557_v53 = vpop.f32.mrf.mxu0 }
 0x47d   : > { %v1618_v58 = vsel %vm815_vm1, %v1557_v53, 0.0 }
 0x484   : > { %v1559_v54 = vpop.f32.mrf.mxu0 }
 0x491   : > { %v1576_v55 = vpop.f32.mrf.mxu1 }
 0x492   : > { %v1619_v57 = vsel %vm815_vm1, %v1576_v55, 0.0 }
 0x493   : > { %v1620_v61 = vadd.f32 %v1619_v57, %v1618_v58 }
 0x494   : > { %v1595_v56 = vpop.f32.mrf.mxu2 }
 0x495   : > { %v1621_v59 = vsel %vm815_vm1, %v1595_v56, 0.0 }
 0x496   : > { %v1622_v62 = vadd.f32 %v1621_v59, %v1620_v61 }
 0x499   : > { %v1578_v60 = vpop.f32.mrf.mxu1 }
 0x49c   : > { %v1597_v63 = vpop.f32.mrf.mxu2  ;;  %v1614_v0 = vpop.f32.mrf.mxu3 }
 0x49d   : > { %v1623_v2 = vsel %vm815_vm1, %v1614_v0, 0.0 }
 0x49e   : > { %v1624_v3 = vadd.f32 %v1623_v2, %v1622_v62 }
 0x4a0   : > { %v1625_v6 = vadd.f32 %v1624_v3, %v2828_v1 }
 0x4a2   : > { %v1630_v7 = vadd.f32 %v2441_v5, %v1625_v6 }
 0x4a4   : > { %v1616_v8 = vpop.f32.mrf.mxu3  ;;  %v1633_v10 = vsel %vm815_vm1, %v1630_v7, 0.0 }
 0x4a5   : > { %1634 = vadd.xlane.f32.xlu1 %v1633_v10 }
 0x518   : > { %v1635_v11 = vpop.xlane.xlu1 %1634 }
 0x519   : > { %v1636_v12 = vmul.f32 %v1635_v11, %v2832_v9 }
 0x51b   : > { %v1637_v13 = vsub.f32 %v1630_v7, %v1636_v12 }
 0x51d   : > { %v1638_v14 = vmul.f32 %v1637_v13, %v1637_v13 }
 0x51f   : > { %v1639_v15 = vsel %vm815_vm1, %v1638_v14, 0.0 }
 0x520   : > { %1640 = vadd.xlane.f32.xlu2 %v1639_v15 }
 0x593   : > { %v1641_v18 = vpop.xlane.xlu2 %1640 }
 0x594   : > { %v1642_v1 = vmul.f32 %v1641_v18, %v2832_v9 }
 0x596   : > { %v1643_v19 = vadd.f32 1e-05, %v1642_v1 }
 0x598   : > { %2466 = vrsqrt.f32 %v1643_v19  ;;  %vm1650_vm7 = vweird.f32 %v1643_v19 }
 0x59e   : > { %v2467_v20 = vpop.eup %2466 }
 0x59f   : > { %v1645_v21 = vmul.f32 %v2467_v20, %v1643_v19  ;;  %vm1651_vm6 = vweird.f32 %v2467_v20 }
 0x5a0   : > { %vm1652_vm12 = vmor %vm1650_vm7, %vm1651_vm6 }
 0x5a1   : > { %v1646_v22 = vmul.f32 %v2467_v20, %v1645_v21 }
 0x5a3   : > { %v1647_v23 = vmul.f32 0.5, %v1646_v22 }
 0x5a5   : > { %v1648_v24 = vsub.f32 1.5, %v1647_v23 }
 0x5a7   : > { %v1649_v25 = vmul.f32 %v2467_v20, %v1648_v24 }
 0x5a9   : > { %v1653_v27 = vsel %vm1652_vm12, %v2467_v20, %v1649_v25 }
 0x5aa   : > { %v1654_v28 = vmul.f32 %v1653_v27, %v1637_v13 }
 0x5ac   : > { %v1658_v30 = vmul.f32 %v2442_v26, %v1654_v28 }
 0x5ae   : > { %v1662_v31 = vadd.f32 %v2443_v29, %v1658_v30 }
 0x5b0   : > { %v1663_v32 = vpack.c.bf16 %v1662_v31, %v1662_v31 }
 0x5b2   : > { %2279 = vmatmul.msk.bf16.vlgmr.msra.gmra.mxu0 %vm815_vm1, %v1663_v32 }
 0x62f   : > { %v1696_v39 = vpop.f32.mrf.mxu0 }
 0x630   : > { %v1697_v40 = vadd.f32 %v2444_v37, %v1696_v39 }
 0x632   : > { %v1701_v38 = vmul.f32 0.044715, %v1697_v40  ;;  %v1700_v47 = vmul.f32 0.5, %v1697_v40 }
 0x634   : > { %v1702_v41 = vmul.f32 %v1701_v38, %v1697_v40 }
 0x636   : > { %v1703_v42 = vmul.f32 %v1702_v41, %v1697_v40 }
 0x637   : > { %v1698_v43 = vpop.f32.mrf.mxu0 }
 0x638   : > { %v1704_v44 = vadd.f32 %v1703_v42, %v1697_v40 }
 0x63a   : > { %v1705_v45 = vmul.f32 0.7978846, %v1704_v44 }
 0x63c   : > { %2468 = vtanh.f32 %v1705_v45 }
 0x642   : > { %v2469_v46 = vpop.eup %2468 }
 0x643   : > { %v1707_v48 = vadd.f32 1.0, %v2469_v46 }
 0x645   : > { %v1708_v49 = vmul.f32 %v1707_v48, %v1700_v47 }
 0x647   : > { %v1709_v50 = vpack.c.bf16 %v1708_v49, %v1708_v49 }
 0x649   : > { %2296 = vmatmul.msk.bf16.vlgmr.msra.gmra.mxu1 %vm1742_vm13, %v1709_v50 }
 0x6c6   : > { %v1755_v52 = vpop.f32.mrf.mxu1 }
 0x6c7   : > { %v1759_v53 = vadd.f32 %v1755_v52, %v1630_v7 }
 0x6c9   : > { %v1764_v54 = vadd.f32 %v2445_v51, %v1759_v53 }
 0x6ca   : > { %1769 = sbr.rel (%p2297_p1) target bundleno = 2585 (0xa19), region = 96 }
 0x6cb   : > { %1765 = vst.msk [vmem:[#allocation2] sm:$0xff] %vm815_vm1, %v1764_v54 }
 0x6ce   : > { %v1757_v55 = vpop.f32.mrf.mxu1 }
 0x6cf   : > { %v1772_v56 = vsel %vm815_vm1, %v1764_v54, 0.0  ;;  %v2346_v62 = vld [vmem:[%s3152_s25 + $0x8] sm:$0xff]  ;;  %v2345_v63 = vld [vmem:[%s3152_s25] sm:$0xff]  ;;  %v2577_v18 = vmov 0   ;;  %vm1837_vm2 = vcmp.lt.s32.totalorder %v2908_v4, 64  ;;  %vm1859_vm4 = vcmask 7168  }
 0x6d0   : > { %1773 = vadd.xlane.f32.xlu0 %v1772_v56  ;;  %1828 = vmatpush.bf16.msra.mxu0 %v2346_v62  ;;  %v2472_v12 = vld [vmem:[%s3153_s18] ss:$0 sm:$0xff]  ;;  %v2578_v28 = vmov 0.0   ;;  %vm1883_vm5 = vcmp.eq.s32.totalorder %v2908_v4, 1  ;;  %vm1882_vm8 = vcmp.eq.s32.totalorder %v2908_v4, 0 }
 0x6d1   : > { %2470 = vset.pattern.permute.xlu1 %v2577_v18  ;;  %2471 = vset.pattern.permute.xlu0 %v2577_v18  ;;  %v1836_v21 = vld [vmem:[%s2767_s0] sm:$0xff]  ;;  %s3155_s0 = sld [smem:[#allocation19_spill]] }
 0x6d2   : > { %vm1857_vm3 = vcmp.ne.s32.totalorder %v1836_v21, 4294967196 }
 0x6d3   : > { %v2307_v29 = vsel %vm1857_vm3, 1.0, %v2578_v28 }
 0x6d4   : > { %1829 = vmatpush.bf16.msra.mxu0 %v2345_v63  ;;  %v1872_v30 = vsel %vm1859_vm4, %v2307_v29, 0.0 }
 0x6d7   : > { %s3157_s30 = scalar_lea.vmem %s3156_s13, %s3155_s0 }
 0x743   : > { %v1774_v57 = vpop.xlane.xlu0 %1773 }
 0x744   : > { %v1775_v58 = vmul.f32 %v1774_v57, %v2832_v9 }
 0x746   : > { %v1776_v59 = vsub.f32 %v1764_v54, %v1775_v58 }
 0x748   : > { %v1777_v60 = vmul.f32 %v1776_v59, %v1776_v59 }
 0x74a   : > { %v1778_v61 = vsel %vm815_vm1, %v1777_v60, 0.0 }
 0x74b   : > { %1779 = vadd.xlane.f32.xlu0 %v1778_v61 }
 0x7be   : > { %v1780_v0 = vpop.xlane.xlu0 %1779 }
 0x7bf   : > { %v1781_v2 = vmul.f32 %v1780_v0, %v2832_v9  ;;  %v2473_v9 = vld [vmem:[%s3154_s14] ss:$0 sm:$0xff] }
 0x7c1   : > { %v1782_v3 = vadd.f32 1e-05, %v1781_v2 }
 0x7c3   : > { %2474 = vrsqrt.f32 %v1782_v3  ;;  %vm1789_vm15 = vweird.f32 %v1782_v3 }
 0x7c9   : > { %v2475_v5 = vpop.eup %2474 }
 0x7ca   : > { %v1784_v6 = vmul.f32 %v2475_v5, %v1782_v3  ;;  %vm1790_vm14 = vweird.f32 %v2475_v5 }
 0x7cb   : > { %vm1791_vm0 = vmor %vm1789_vm15, %vm1790_vm14 }
 0x7cc   : > { %v1785_v7 = vmul.f32 %v2475_v5, %v1784_v6 }
 0x7ce   : > { %v1786_v8 = vmul.f32 0.5, %v1785_v7 }
 0x7d0   : > { %v1787_v10 = vsub.f32 1.5, %v1786_v8 }
 0x7d2   : > { %v1788_v11 = vmul.f32 %v2475_v5, %v1787_v10 }
 0x7d4   : > { %v1792_v13 = vsel %vm1791_vm0, %v2475_v5, %v1788_v11 }
 0x7d5   : > { %v1793_v14 = vmul.f32 %v1792_v13, %v1776_v59 }
 0x7d7   : > { %v1797_v15 = vmul.f32 %v2472_v12, %v1793_v14 }
 0x7d9   : > { %v1801_v16 = vadd.f32 %v2473_v9, %v1797_v15 }
 0x7db   : > { %v1802_v17 = vpack.c.bf16 %v1801_v16, %v1801_v16 }
 0x7dd   : > { %2306 = vmatmul.msk.bf16.vlgmr.msra.gmra.mxu0 %vm815_vm1, %v1802_v17 }
 0x85a   : > { %v1831_v1 = vpop.f32.mrf.mxu0 }
 0x85b   : > { %1835 = vst [vmem:[%s742_s27] sm:$0xff] %v1831_v1  ;;  %v1838_v19 = vsel %vm1837_vm2, %v1831_v1, -1e+30 }
 0x85c   : > { %1839 = vmax.xlane.f32.xlu1 %v1838_v19 }
 0x862   : > { %v1833_v20 = vpop.f32.mrf.mxu0 }
 0x875   : > { %1850 = vperm.xlu1 %2470, %v1836_v21  }
 0x8cf   : > { %v1840_v22 = vpop.xlane.xlu1 %1839 }
 0x8d0   : > { %v1841_v23 = vsub.f32 %v1838_v19, %v1840_v22 }
 0x8d2   : > { %v1842_v24 = vmul.f32 1.442695, %v1841_v23 }
 0x8d4   : > { %2476 = vpow2.f32 %v1842_v24 }
 0x8da   : > { %v2477_v25 = vpop.eup %2476 }
 0x8db   : > { %1844 = vadd.xlane.f32.xlu2 %v2477_v25 }
 0x8e7   : > { %v1851_v26 = vpop.permute.xlu1 %1850 }
 0x8e8   : > { %vm1852_vm1 = vcmp.eq.s32.totalorder %v2908_v4, %v1851_v26 }
 0x8e9   : > { %v1853_v27 = vsel %vm1852_vm1, %v1831_v1, 0.0 }
 0x8ea   : > { %1854 = vadd.xlane.f32.xlu2 %v1853_v27 }
 0x8f2   : > { %1873 = vadd.xlane.f32.xlu2 %v1872_v30 }
 0x94e   : > { %v1845_v31 = vpop.xlane.xlu2 %1844 }
 0x94f   : > { %2478 = vlog2.f32 %v1845_v31 }
 0x955   : > { %v2479_v32 = vpop.eup %2478 }
 0x956   : > { %v1847_v33 = vmul.f32 0.6931472, %v2479_v32 }
 0x958   : > { %v1848_v34 = vadd.f32 %v1847_v33, %v1840_v22 }
 0x95d   : > { %v1855_v35 = vpop.xlane.xlu2 %1854 }
 0x95e   : > { %v1856_v36 = vsub.f32 %v1848_v34, %v1855_v35 }
 0x960   : > { %v1858_v37 = vsel %vm1857_vm3, %v1856_v36, 0.0 }
 0x961   : > { %v1860_v39 = vsel %vm1859_vm4, %v1858_v37, 0.0 }
 0x962   : > { %1861 = vadd.xlane.f32.xlu0 %v1860_v39 }
 0x965   : > { %v1874_v40 = vpop.xlane.xlu2 %1873 }
 0x966   : > { %v1875_v38 = vrot.slane %v1874_v40, 4 }
 0x968   : > { %v1876_v41 = vadd.f32 %v1875_v38, %v1874_v40 }
 0x96a   : > { %v1877_v42 = vrot.slane %v1876_v41, 2 }
 0x96c   : > { %v1878_v46 = vadd.f32 %v1877_v42, %v1876_v41 }
 0x96e   : > { %v1879_v49 = vrot.slane %v1878_v46, 1 }
 0x970   : > { %v1880_v52 = vadd.f32 %v1879_v49, %v1878_v46 }
 0x9d5   : > { %v1862_v43 = vpop.xlane.xlu0 %1861 }
 0x9d6   : > { %v1863_v44 = vrot.slane %v1862_v43, 4 }
 0x9d8   : > { %v1864_v45 = vadd.f32 %v1863_v44, %v1862_v43 }
 0x9da   : > { %v1865_v47 = vrot.slane %v1864_v45, 2 }
 0x9dc   : > { %v1866_v48 = vadd.f32 %v1865_v47, %v1864_v45 }
 0x9de   : > { %v1867_v50 = vrot.slane %v1866_v48, 1 }
 0x9e0   : > { %v1868_v51 = vadd.f32 %v1867_v50, %v1866_v48 }
 0x9e2   : > { %2349 = vpush %v1868_v51 }
 0x9e3   : > { %2351 = vpush %v1880_v52 }
 0xa13   : > { %s2350_s28 = spop %2349 }
 0xa14   : > { %v1886_v53 = vstv %s2350_s28  ;;  %s2352_s15 = spop %2351 }
 0xa15   : > { %v1884_v54 = vstv %s2352_s15 }
 0xa16   : > { %v1885_v55 = vsel %vm1883_vm5, %v1884_v54, 0.0 }
 0xa17   : > { %v1887_v56 = vsel %vm1882_vm8, %v1886_v53, %v1885_v55 }
 0xa18   : > { %1888 = vst [vmem:[%s3157_s30] sm:$0x1] %v1887_v56 }
 0xa19 PF: > { %s3158_s1 = sld [smem:[#allocation10_spill]]  ;;  %s1905_s2 = sshll.u32 %s742_s27, 4  ;;  %s1906_s2 = int_to_ptr.vmem [resolvable:$true] %s1905_s2 }
 0xa1a   : > { %s3159_s5 = sld [smem:[#allocation7_spill]] }
 0xa1b   : > { %s3161_s6 = sld [smem:[#allocation31_spill]] }
 0xa1f   : > { %s2309_s16 = sshll.u32 %s3158_s1, 3 }
 0xa20   : > { %s3162_s23 = sand.u32 1, %s3159_s5  }
 0xa21   : > { %s1903_s22 = scalar_lea.hbm %s3161_s6, %s2309_s16  ;;  %s1890_s18 = scalar_lea.sflag [#allocation4], %s3162_s23 }
 0xa22   : > { %s1907_s17 = sshll.u32 %s1903_s22, 4  ;;  %s2500_s28 = scalar_lea.hbm %s3161_s6, 16  ;;  %s1908_s17 = int_to_ptr.hbm [resolvable:$true] %s1907_s17 }
 0xa23   : > { %s2494_s24 = sshra.s32 %s1908_s17, 4  ;;  %s2495_s24 = int_to_ptr.hbm [resolvable:$true] %s2494_s24 }
 0xa24   : > { %s2496_s21 = scalar_lea.hbm %s2495_s24, 8  ;;  %p2501_p6 = scmp.lt.s32.totalorder %s2495_s24, %s3161_s6 }
 0xa25   : > { %p2497_p2 = scmp.ne.s32.totalorder %s2495_s24, %s2496_s21  ;;  %p2502_p7 = scmp.lt.s32.totalorder %s2500_s28, %s2496_s21 }
 0xa27   : > { %p2498_p4 = pnand %p2497_p2, %p2723_p3  ;;  %p2503_p8 = por %p2502_p7, %p2501_p6 }
 0xa29   : > { %p2499_p5 = pneg %p2498_p4 }
 0xa2b   : > { %p2504_p10 = pnand %p2503_p8, %p2499_p5 }
 0xa2d   : > { %2507 = shalt.err (!%p2504_p10)
}
 0xa2e   : > { %2353 = dma.vmem_to_hbm [thread:$0]  (%p2723_p3), %s1906_s2, 128, %s1908_s17, %s1890_s18  }
 0xa2f PF: > { %s3163_s19 = sld [smem:[#allocation13_spill]] }
 0xa30   : > { %s3164_s27 = sld [smem:[#allocation6_spill]] }
 0xa35   : > { %p2359_p11 = scmp.ge.s32.totalorder %s3163_s19, 2 }
 0xa36   : > { %s1922_s13 = sand.u32 1, %s3164_s27  }
 0xa37   : > { %p2356_p12 = pnand %p2359_p11, %p2733_p9  ;;  %s1923_s30 = scalar_lea.sflag [#allocation4], %s1922_s13 }
 0xa39   : > { %p2357_p13 = pneg %p2356_p12 }
 0xa3b   : > { %2541 = dma.done.wait (%p2357_p13), %s1923_s30, 128  }
 0xa3c   : > { %2543 = vsyncadd (%p2357_p13), %s1923_s30, 4294967168  ;;  %s32_s20 = sadd.s32 1, %s3163_s19   ;;  %s3166_s27 = sld [smem:[#allocation7_spill]] }
 0xa3d   : > { %p29_p0 = scmp.ge.s32.totalorder %s32_s20, 6   ;;  %s3167_s28 = sld [smem:[#allocation8_spill]] }
 0xa3e   : > { %s3168_s29 = sld [smem:[#allocation18_spill]] }
 0xa3f   : > { %s3169_s30 = sld [smem:[#allocation11_spill]]  ;;  %31 = sbr.rel (!%p29_p0) target bundleno = 19 (0x13), region = 182 }
 0xa40   : > { %s3170_s0 = sld [smem:[#allocation12_spill]] }
 0xa41   : > { %s3171_s19 = sld [smem:[#allocation14_spill]] }
 0xa42   : > { %s3172_s1 = sld [smem:[#allocation16_spill]] }
 0xa44   :  { %1935 = vsyncpa [#allocation4], 1 }
 0xa45   :  { %1937 = vsyncpa [#allocation4 + $0x1], 1 }

</bundles_post_ra>
